<compile_context>
chip_gen: v7x
topology: tpu7x:2x2x1
jax: 0.10.0
libtpu: 0.0.40
codegen_flags: <defaults>
</compile_context>

<pallas_src>
import functools
import math

import jax
import jax.numpy as jnp
import numpy as np
from jax.experimental import pallas as pl
from jax.experimental.pallas import tpu as pltpu


# ----------------------------- fused Pallas kernel ---------------------------
def _transformer_kernel(
    emb_ref, pe_ref,
    wq_ref, bq_ref, wk_ref, bk_ref, wv_ref, bv_ref, wo_ref, bo_ref,
    ln1g_ref, ln1b_ref, w1_ref, b1_ref, w2_ref, b2_ref, ln2g_ref, ln2b_ref,
    dec_w_ref, dec_b_ref,
    out_ref,
    *, S, B, E, nhead, nlayers, eps=1e-5,
):
    """Whole forward pass; everything lives in VMEM for the single invocation."""
    H = nhead
    D = E // H
    scale = 1.0 / math.sqrt(D)
    NEG = jnp.float32(-1e30)

    # --- embedding * sqrt(E) + positional encoding as a broadcast add.
    x = emb_ref[...] * math.sqrt(E)                                # [B*S, E]
    x = (x.reshape(B, S, E) + pe_ref[...]).reshape(B * S, E)       # PE broadcast over B

    # --- causal mask built in-kernel (matches _generate_square_subsequent_mask)
    qi = jax.lax.broadcasted_iota(jnp.int32, (S, S), 0)
    ki = jax.lax.broadcasted_iota(jnp.int32, (S, S), 1)
    mask = jnp.where(ki <= qi, jnp.float32(0.0), NEG)              # [S, S]

    def layer_norm(v, g, b):
        mu = jnp.mean(v, axis=-1, keepdims=True)
        var = jnp.mean(jnp.square(v - mu), axis=-1, keepdims=True)
        return (v - mu) * jax.lax.rsqrt(var + eps) * g + b

    def split_heads(t):
        # [B*S, E] -> [H*B, S, D]; leading-dim reshapes are free, only one
        # small lane slice per head (offset h*D within E lanes).
        t3 = t.reshape(B, S, E)
        return jnp.concatenate(
            [t3[:, :, h * D:(h + 1) * D] for h in range(H)], axis=0)

    # TODO(synk): nn.Dropout layers omitted (inference / eval-mode semantics).
    # TODO(synk): for non-toy nlayers/B, move layers onto an 'arbitrary' grid
    # axis (BlockSpec-streamed per-layer weights) and add a 'parallel' row-tile
    # axis for v7x's two TensorCores instead of this static unroll.
    for l in range(nlayers):
        # Three separate projections: avoids lane-splitting a fused [*,3E] QKV.
        q = jnp.dot(x, wq_ref[l], preferred_element_type=jnp.float32) + bq_ref[l]
        k = jnp.dot(x, wk_ref[l], preferred_element_type=jnp.float32) + bk_ref[l]
        v = jnp.dot(x, wv_ref[l], preferred_element_type=jnp.float32) + bv_ref[l]

        qh, kh, vh = split_heads(q), split_heads(k), split_heads(v)   # [H*B, S, D]

        # Batched attention over g = (head, batch): two einsums per layer.
        s = jnp.einsum("gqd,gkd->gqk", qh, kh,
                       preferred_element_type=jnp.float32) * scale + mask
        m = jnp.max(s, axis=-1, keepdims=True)
        p = jnp.exp(s - m)
        a = p / jnp.sum(p, axis=-1, keepdims=True)                    # exact softmax
        ctx_g = jnp.einsum("gqk,gkd->gqd", a, vh,
                           preferred_element_type=jnp.float32)        # [H*B, S, D]

        # Back to [B*S, E]: heads rejoin the lane dim with one small concat.
        ctx = jnp.concatenate(
            [ctx_g[h * B:(h + 1) * B] for h in range(H)], axis=-1).reshape(B * S, E)

        # Output projection + residual + LayerNorm (post-norm).
        attn_out = jnp.dot(ctx, wo_ref[l], preferred_element_type=jnp.float32) + bo_ref[l]
        x = layer_norm(x + attn_out, ln1g_ref[l], ln1b_ref[l])

        # FFN (relu) + residual + LayerNorm.
        h1 = jnp.maximum(
            jnp.dot(x, w1_ref[l], preferred_element_type=jnp.float32) + b1_ref[l], 0.0)
        ff = jnp.dot(h1, w2_ref[l], preferred_element_type=jnp.float32) + b2_ref[l]
        x = layer_norm(x + ff, ln2g_ref[l], ln2b_ref[l])

    # --- decoder + log_softmax. The padded-vocab mask is folded into the
    # packed decoder weights (zero columns) and bias (-1e30 entries), so no
    # iota/select is needed on the output critical path.
    logits = jnp.dot(x, dec_w_ref[...], preferred_element_type=jnp.float32) + dec_b_ref[...]
    zmax = jnp.max(logits, axis=-1, keepdims=True)
    z = logits - zmax
    lse = jnp.log(jnp.sum(jnp.exp(z), axis=-1, keepdims=True))
    out_ref[...] = (z - lse).astype(out_ref.dtype)


# ----------------------------- model glue -----------------------------------
def positional_encoding(max_len, d_model):
    pos = np.arange(max_len, dtype=np.float32)[:, None]
    div = np.exp(np.arange(0, d_model, 2, dtype=np.float32) * (-math.log(10000.0) / d_model))
    pe = np.zeros((max_len, d_model), np.float32)
    pe[:, 0::2] = np.sin(pos * div)
    pe[:, 1::2] = np.cos(pos * div)
    return jnp.asarray(pe)                      # [max_len, d_model]


def pack_params(params, ntoken, npad):
    """Stack per-layer params; fold the padded-vocab mask into dec_w/dec_b."""
    layers = params["layers"]
    stack = lambda name: jnp.stack([p[name] for p in layers])
    pad = npad - ntoken
    dec_w = jnp.pad(params["dec_w"], ((0, 0), (0, pad)))          # zero padded columns
    dec_b = jnp.pad(params["dec_b"], ((0, 0), (0, pad)))
    vocab_mask = jnp.concatenate(
        [jnp.zeros((1, ntoken), jnp.float32),
         jnp.full((1, pad), -1e30, jnp.float32)], axis=1)
    return {
        "emb": params["emb"],
        "pe": params["pe"],
        "wq": stack("wq"), "bq": stack("bq"),
        "wk": stack("wk"), "bk": stack("bk"),
        "wv": stack("wv"), "bv": stack("bv"),
        "wo": stack("wo"), "bo": stack("bo"),
        "ln1_g": stack("ln1_g"), "ln1_b": stack("ln1_b"),
        "w1": stack("w1"), "b1": stack("b1"),
        "w2": stack("w2"), "b2": stack("b2"),
        "ln2_g": stack("ln2_g"), "ln2_b": stack("ln2_b"),
        "dec_w": dec_w,
        "dec_b": dec_b + vocab_mask,
    }


@functools.partial(jax.jit, static_argnames=("nhead", "ntoken"))
def transformer_forward(packed, src, *, nhead, ntoken):
    S, B = src.shape
    E = packed["emb"].shape[1]
    L = packed["wq"].shape[0]
    NPAD = packed["dec_w"].shape[1]

    # TODO(synk): the embedding gather could be pulled into the kernel via
    # PrefetchScalarGridSpec + pl.Element row-gather; kept as one tiny XLA take.
    emb = jnp.take(packed["emb"], src.T.reshape(-1), axis=0)   # [B*S, E], batch-major
    pe = packed["pe"][:S]                                      # [S, E]

    kernel = functools.partial(
        _transformer_kernel, S=S, B=B, E=E, nhead=nhead, nlayers=L)

    args = (emb, pe,
            packed["wq"], packed["bq"], packed["wk"], packed["bk"],
            packed["wv"], packed["bv"], packed["wo"], packed["bo"],
            packed["ln1_g"], packed["ln1_b"],
            packed["w1"], packed["b1"], packed["w2"], packed["b2"],
            packed["ln2_g"], packed["ln2_b"],
            packed["dec_w"], packed["dec_b"])

    vmem_spec = pl.BlockSpec(memory_space=pltpu.MemorySpace.VMEM)
    out_flat = pl.pallas_call(
        kernel,
        out_shape=jax.ShapeDtypeStruct((B * S, NPAD), jnp.float32),
        in_specs=[vmem_spec] * len(args),
        out_specs=vmem_spec,
        compiler_params=pltpu.CompilerParams(vmem_limit_bytes=32 * 1024 * 1024),
    )(*args)

    # Un-pad vocab and restore PyTorch's [seq, batch, ntoken] layout.
    return out_flat[:, :ntoken].reshape(B, S, ntoken).transpose(1, 0, 2)


# ----------------------------- parameter init --------------------------------
def init_params(key, ntoken, emsize, nhead, nhid, nlayers, max_len=5000):
    def uni(k, shape, bound):
        return jax.random.uniform(k, shape, jnp.float32, -bound, bound)

    keys = iter(jax.random.split(key, 4 + 12 * nlayers))
    params = {
        "emb": uni(next(keys), (ntoken, emsize), 0.1),       # init_weights: U(-0.1, 0.1)
        "pe": positional_encoding(max_len, emsize),
        "dec_w": uni(next(keys), (emsize, ntoken), 0.1),     # stored [in, out] (= W.T of nn.Linear)
        "dec_b": uni(next(keys), (1, ntoken), 1.0 / math.sqrt(emsize)),
        "layers": [],
    }
    be = 1.0 / math.sqrt(emsize)
    bh = 1.0 / math.sqrt(nhid)
    for _ in range(nlayers):
        layer = {
            "wq": uni(next(keys), (emsize, emsize), be), "bq": uni(next(keys), (1, emsize), be),
            "wk": uni(next(keys), (emsize, emsize), be), "bk": uni(next(keys), (1, emsize), be),
            "wv": uni(next(keys), (emsize, emsize), be), "bv": uni(next(keys), (1, emsize), be),
            "wo": uni(next(keys), (emsize, emsize), be), "bo": jnp.zeros((1, emsize), jnp.float32),
            "w1": uni(next(keys), (emsize, nhid), be),   "b1": uni(next(keys), (1, nhid), be),
            "w2": uni(next(keys), (nhid, emsize), bh),   "b2": uni(next(keys), (1, emsize), bh),
            "ln1_g": jnp.ones((1, emsize), jnp.float32), "ln1_b": jnp.zeros((1, emsize), jnp.float32),
            "ln2_g": jnp.ones((1, emsize), jnp.float32), "ln2_b": jnp.zeros((1, emsize), jnp.float32),
        }
        params["layers"].append(layer)
    return params


# ----------------------------- pure-JAX reference ----------------------------
def _ln(x, g, b, eps=1e-5):
    mu = jnp.mean(x, -1, keepdims=True)
    var = jnp.mean(jnp.square(x - mu), -1, keepdims=True)
    return (x - mu) * jax.lax.rsqrt(var + eps) * g + b


def causal_mask(S):
    i = jnp.arange(S)[:, None]
    j = jnp.arange(S)[None, :]
    return jnp.where(j <= i, 0.0, -jnp.inf).astype(jnp.float32)


def reference_forward(params, src, nhead):
    S, B = src.shape
    E = params["emb"].shape[1]
    D = E // nhead
    x = jnp.take(params["emb"], src, axis=0) * math.sqrt(E) + params["pe"][:S][:, None, :]
    mask = causal_mask(S)
    for p in params["layers"]:
        x2 = x.reshape(S * B, E)
        q = x2 @ p["wq"] + p["bq"]
        k = x2 @ p["wk"] + p["bk"]
        v = x2 @ p["wv"] + p["bv"]

        def sh(t):
            return t.reshape(S, B, nhead, D).transpose(1, 2, 0, 3).reshape(B * nhead, S, D)

        s = jnp.einsum("hqd,hkd->hqk", sh(q), sh(k)) / math.sqrt(D) + mask[None]
        a = jax.nn.softmax(s, axis=-1)
        ctx = jnp.einsum("hqk,hkd->hqd", a, sh(v))
        ctx = ctx.reshape(B, nhead, S, D).transpose(2, 0, 1, 3).reshape(S * B, E)
        y = _ln(x2 + (ctx @ p["wo"] + p["bo"]), p["ln1_g"], p["ln1_b"])
        h = jnp.maximum(y @ p["w1"] + p["b1"], 0.0)
        y = _ln(y + (h @ p["w2"] + p["b2"]), p["ln2_g"], p["ln2_b"])
        x = y.reshape(S, B, E)
    logits = x.reshape(S * B, E) @ params["dec_w"] + params["dec_b"]
    return jax.nn.log_softmax(logits, axis=-1).reshape(S, B, -1)


# ----------------------------- main -------------------------------------------
if __name__ == "__main__":
    ntoken, emsize, nhead, nhid, nlayers = 50, 32, 2, 64, 2
    seq, batch = 8, 2

    key = jax.random.PRNGKey(0)
    pkey, skey = jax.random.split(key)
    params = init_params(pkey, ntoken, emsize, nhead, nhid, nlayers)
    src = jax.random.randint(skey, (seq, batch), 0, ntoken, dtype=jnp.int32)

    npad = pl.cdiv(ntoken, 128) * 128          # lane-dense (128-wide) decoder output
    packed = pack_params(params, ntoken, npad)

    out = transformer_forward(packed, src, nhead=nhead, ntoken=ntoken)
    out = jax.block_until_ready(out)

    assert out.shape == (seq, batch, ntoken), out.shape
    assert bool(jnp.all(jnp.isfinite(out)))

    ref = reference_forward(params, src, nhead)
    max_err = float(jnp.max(jnp.abs(out - ref)))
    assert max_err < 1e-3, f"mismatch vs JAX reference: {max_err}"

    print("KERNEL_OK")
</pallas_src>

<mosaic_0001>
module attributes {stable_mosaic.version = 11 : i64} {
  func.func @_transformer_kernel(%arg0: memref<16x32xf32, #tpu.memory_space<vmem>>, %arg1: memref<8x32xf32, #tpu.memory_space<vmem>>, %arg2: memref<2x32x32xf32, #tpu.memory_space<vmem>>, %arg3: memref<2x1x32xf32, #tpu.memory_space<vmem>>, %arg4: memref<2x32x32xf32, #tpu.memory_space<vmem>>, %arg5: memref<2x1x32xf32, #tpu.memory_space<vmem>>, %arg6: memref<2x32x32xf32, #tpu.memory_space<vmem>>, %arg7: memref<2x1x32xf32, #tpu.memory_space<vmem>>, %arg8: memref<2x32x32xf32, #tpu.memory_space<vmem>>, %arg9: memref<2x1x32xf32, #tpu.memory_space<vmem>>, %arg10: memref<2x1x32xf32, #tpu.memory_space<vmem>>, %arg11: memref<2x1x32xf32, #tpu.memory_space<vmem>>, %arg12: memref<2x32x64xf32, #tpu.memory_space<vmem>>, %arg13: memref<2x1x64xf32, #tpu.memory_space<vmem>>, %arg14: memref<2x64x32xf32, #tpu.memory_space<vmem>>, %arg15: memref<2x1x32xf32, #tpu.memory_space<vmem>>, %arg16: memref<2x1x32xf32, #tpu.memory_space<vmem>>, %arg17: memref<2x1x32xf32, #tpu.memory_space<vmem>>, %arg18: memref<32x128xf32, #tpu.memory_space<vmem>>, %arg19: memref<1x128xf32, #tpu.memory_space<vmem>>, %arg20: memref<16x128xf32, #tpu.memory_space<vmem>>) attributes {dimension_semantics = [], scalar_prefetch = 0 : i64, scratch_operands = 0 : i64, tpu.core_type = #tpu.core_type<tc>} {
    %c0 = arith.constant 0 : index
    %c0_0 = arith.constant 0 : index
    %0 = vector.load %arg0[%c0, %c0_0] : memref<16x32xf32, #tpu.memory_space<vmem>>, vector<16x32xf32>
    %cst = arith.constant 5.65685415 : f32
    %1 = vector.broadcast %cst : f32 to vector<16x32xf32>
    %2 = arith.mulf %0, %1 : vector<16x32xf32>
    %3 = vector.shape_cast %2 : vector<16x32xf32> to vector<2x8x32xf32>
    %c0_1 = arith.constant 0 : index
    %c0_2 = arith.constant 0 : index
    %4 = vector.load %arg1[%c0_1, %c0_2] : memref<8x32xf32, #tpu.memory_space<vmem>>, vector<8x32xf32>
    %5 = vector.shape_cast %4 : vector<8x32xf32> to vector<1x8x32xf32>
    %6 = vector.broadcast %5 : vector<1x8x32xf32> to vector<2x8x32xf32>
    %7 = arith.addf %3, %6 : vector<2x8x32xf32>
    %8 = vector.shape_cast %7 : vector<2x8x32xf32> to vector<16x32xf32>
    %9 = tpu.iota {dimensions = array<i32: 0>} : vector<8x8xi32>
    %10 = tpu.iota {dimensions = array<i32: 1>} : vector<8x8xi32>
    %11 = arith.cmpi sle, %10, %9 : vector<8x8xi32>
    %cst_3 = arith.constant 0.000000e+00 : f32
    %cst_4 = arith.constant -1.000000e+30 : f32
    %12 = vector.broadcast %cst_3 : f32 to vector<8x8xf32>
    %13 = vector.broadcast %cst_4 : f32 to vector<8x8xf32>
    %14 = arith.select %11, %12, %13 : vector<8x8xi1>, vector<8x8xf32>
    %c0_5 = arith.constant 0 : index
    %c0_6 = arith.constant 0 : index
    %c0_7 = arith.constant 0 : index
    %15 = vector.load %arg2[%c0_5, %c0_6, %c0_7] : memref<2x32x32xf32, #tpu.memory_space<vmem>>, vector<1x32x32xf32>
    %16 = vector.shape_cast %15 : vector<1x32x32xf32> to vector<32x32xf32>
    %cst_8 = arith.constant dense<0.000000e+00> : vector<16x32xf32>
    %17 = tpu.matmul %8, %16, %cst_8 {dimension_numbers = #tpu.dot_dimension_numbers<[1], [0], [0], [1], [0, 0, 1, 1], [], []>} : vector<16x32xf32>, vector<32x32xf32>, vector<16x32xf32> -> vector<16x32xf32>
    %c0_9 = arith.constant 0 : index
    %c0_10 = arith.constant 0 : index
    %c0_11 = arith.constant 0 : index
    %18 = vector.load %arg3[%c0_9, %c0_10, %c0_11] : memref<2x1x32xf32, #tpu.memory_space<vmem>>, vector<1x1x32xf32>
    %19 = vector.shape_cast %18 : vector<1x1x32xf32> to vector<1x32xf32>
    %20 = vector.broadcast %19 : vector<1x32xf32> to vector<16x32xf32>
    %21 = arith.addf %17, %20 : vector<16x32xf32>
    %c0_12 = arith.constant 0 : index
    %c0_13 = arith.constant 0 : index
    %c0_14 = arith.constant 0 : index
    %22 = vector.load %arg4[%c0_12, %c0_13, %c0_14] : memref<2x32x32xf32, #tpu.memory_space<vmem>>, vector<1x32x32xf32>
    %23 = vector.shape_cast %22 : vector<1x32x32xf32> to vector<32x32xf32>
    %cst_15 = arith.constant dense<0.000000e+00> : vector<16x32xf32>
    %24 = tpu.matmul %8, %23, %cst_15 {dimension_numbers = #tpu.dot_dimension_numbers<[1], [0], [0], [1], [0, 0, 1, 1], [], []>} : vector<16x32xf32>, vector<32x32xf32>, vector<16x32xf32> -> vector<16x32xf32>
    %c0_16 = arith.constant 0 : index
    %c0_17 = arith.constant 0 : index
    %c0_18 = arith.constant 0 : index
    %25 = vector.load %arg5[%c0_16, %c0_17, %c0_18] : memref<2x1x32xf32, #tpu.memory_space<vmem>>, vector<1x1x32xf32>
    %26 = vector.shape_cast %25 : vector<1x1x32xf32> to vector<1x32xf32>
    %27 = vector.broadcast %26 : vector<1x32xf32> to vector<16x32xf32>
    %28 = arith.addf %24, %27 : vector<16x32xf32>
    %c0_19 = arith.constant 0 : index
    %c0_20 = arith.constant 0 : index
    %c0_21 = arith.constant 0 : index
    %29 = vector.load %arg6[%c0_19, %c0_20, %c0_21] : memref<2x32x32xf32, #tpu.memory_space<vmem>>, vector<1x32x32xf32>
    %30 = vector.shape_cast %29 : vector<1x32x32xf32> to vector<32x32xf32>
    %cst_22 = arith.constant dense<0.000000e+00> : vector<16x32xf32>
    %31 = tpu.matmul %8, %30, %cst_22 {dimension_numbers = #tpu.dot_dimension_numbers<[1], [0], [0], [1], [0, 0, 1, 1], [], []>} : vector<16x32xf32>, vector<32x32xf32>, vector<16x32xf32> -> vector<16x32xf32>
    %c0_23 = arith.constant 0 : index
    %c0_24 = arith.constant 0 : index
    %c0_25 = arith.constant 0 : index
    %32 = vector.load %arg7[%c0_23, %c0_24, %c0_25] : memref<2x1x32xf32, #tpu.memory_space<vmem>>, vector<1x1x32xf32>
    %33 = vector.shape_cast %32 : vector<1x1x32xf32> to vector<1x32xf32>
    %34 = vector.broadcast %33 : vector<1x32xf32> to vector<16x32xf32>
    %35 = arith.addf %31, %34 : vector<16x32xf32>
    %36 = vector.shape_cast %21 : vector<16x32xf32> to vector<2x8x32xf32>
    %37 = vector.extract_strided_slice %36 {offsets = [0, 0, 0], sizes = [2, 8, 16], strides = [1, 1, 1]} : vector<2x8x32xf32> to vector<2x8x16xf32>
    %38 = vector.extract_strided_slice %36 {offsets = [0, 0, 16], sizes = [2, 8, 16], strides = [1, 1, 1]} : vector<2x8x32xf32> to vector<2x8x16xf32>
    %39 = tpu.concatenate %37, %38 in 0 : vector<2x8x16xf32>, vector<2x8x16xf32> -> vector<4x8x16xf32>
    %40 = vector.shape_cast %28 : vector<16x32xf32> to vector<2x8x32xf32>
    %41 = vector.extract_strided_slice %40 {offsets = [0, 0, 0], sizes = [2, 8, 16], strides = [1, 1, 1]} : vector<2x8x32xf32> to vector<2x8x16xf32>
    %42 = vector.extract_strided_slice %40 {offsets = [0, 0, 16], sizes = [2, 8, 16], strides = [1, 1, 1]} : vector<2x8x32xf32> to vector<2x8x16xf32>
    %43 = tpu.concatenate %41, %42 in 0 : vector<2x8x16xf32>, vector<2x8x16xf32> -> vector<4x8x16xf32>
    %44 = vector.shape_cast %35 : vector<16x32xf32> to vector<2x8x32xf32>
    %45 = vector.extract_strided_slice %44 {offsets = [0, 0, 0], sizes = [2, 8, 16], strides = [1, 1, 1]} : vector<2x8x32xf32> to vector<2x8x16xf32>
    %46 = vector.extract_strided_slice %44 {offsets = [0, 0, 16], sizes = [2, 8, 16], strides = [1, 1, 1]} : vector<2x8x32xf32> to vector<2x8x16xf32>
    %47 = tpu.concatenate %45, %46 in 0 : vector<2x8x16xf32>, vector<2x8x16xf32> -> vector<4x8x16xf32>
    "tpu.trace_start"() <{level = 10 : i32, message = "gqd,gkd->gqk"}> : () -> ()
    %cst_26 = arith.constant dense<0.000000e+00> : vector<4x8x8xf32>
    %48 = tpu.matmul %39, %43, %cst_26 {dimension_numbers = #tpu.dot_dimension_numbers<[2], [2], [1], [1], [0, 0, 0, 1, 1, 1], [0], [0]>} : vector<4x8x16xf32>, vector<4x8x16xf32>, vector<4x8x8xf32> -> vector<4x8x8xf32>
    "tpu.trace_stop"() : () -> ()
    %cst_27 = arith.constant 2.500000e-01 : f32
    %49 = vector.broadcast %cst_27 : f32 to vector<4x8x8xf32>
    %50 = arith.mulf %48, %49 : vector<4x8x8xf32>
    %51 = vector.shape_cast %14 : vector<8x8xf32> to vector<1x8x8xf32>
    %52 = vector.broadcast %51 : vector<1x8x8xf32> to vector<4x8x8xf32>
    %53 = arith.addf %50, %52 : vector<4x8x8xf32>
    %cst_28 = arith.constant dense<0xFF800000> : vector<4x8xf32>
    %54 = vector.multi_reduction <maximumf>, %53, %cst_28 [2] : vector<4x8x8xf32> to vector<4x8xf32>
    %55 = vector.shape_cast %54 : vector<4x8xf32> to vector<4x8x1xf32>
    %56 = vector.broadcast %55 : vector<4x8x1xf32> to vector<4x8x8xf32>
    %57 = arith.subf %53, %56 : vector<4x8x8xf32>
    %58 = math.exp %57 : vector<4x8x8xf32>
    %cst_29 = arith.constant dense<0.000000e+00> : vector<4x8xf32>
    %59 = vector.multi_reduction <add>, %58, %cst_29 [2] : vector<4x8x8xf32> to vector<4x8xf32>
    %60 = vector.shape_cast %59 : vector<4x8xf32> to vector<4x8x1xf32>
    %61 = vector.broadcast %60 : vector<4x8x1xf32> to vector<4x8x8xf32>
    %62 = arith.divf %58, %61 : vector<4x8x8xf32>
    "tpu.trace_start"() <{level = 10 : i32, message = "gqk,gkd->gqd"}> : () -> ()
    %cst_30 = arith.constant dense<0.000000e+00> : vector<4x8x16xf32>
    %63 = tpu.matmul %62, %47, %cst_30 {dimension_numbers = #tpu.dot_dimension_numbers<[2], [1], [1], [2], [0, 0, 0, 1, 1, 2], [0], [0]>} : vector<4x8x8xf32>, vector<4x8x16xf32>, vector<4x8x16xf32> -> vector<4x8x16xf32>
    "tpu.trace_stop"() : () -> ()
    %64 = vector.extract_strided_slice %63 {offsets = [0, 0, 0], sizes = [2, 8, 16], strides = [1, 1, 1]} : vector<4x8x16xf32> to vector<2x8x16xf32>
    %65 = vector.extract_strided_slice %63 {offsets = [2, 0, 0], sizes = [2, 8, 16], strides = [1, 1, 1]} : vector<4x8x16xf32> to vector<2x8x16xf32>
    %66 = tpu.concatenate %64, %65 in 2 : vector<2x8x16xf32>, vector<2x8x16xf32> -> vector<2x8x32xf32>
    %67 = vector.shape_cast %66 : vector<2x8x32xf32> to vector<16x32xf32>
    %c0_31 = arith.constant 0 : index
    %c0_32 = arith.constant 0 : index
    %c0_33 = arith.constant 0 : index
    %68 = vector.load %arg8[%c0_31, %c0_32, %c0_33] : memref<2x32x32xf32, #tpu.memory_space<vmem>>, vector<1x32x32xf32>
    %69 = vector.shape_cast %68 : vector<1x32x32xf32> to vector<32x32xf32>
    %cst_34 = arith.constant dense<0.000000e+00> : vector<16x32xf32>
    %70 = tpu.matmul %67, %69, %cst_34 {dimension_numbers = #tpu.dot_dimension_numbers<[1], [0], [0], [1], [0, 0, 1, 1], [], []>} : vector<16x32xf32>, vector<32x32xf32>, vector<16x32xf32> -> vector<16x32xf32>
    %c0_35 = arith.constant 0 : index
    %c0_36 = arith.constant 0 : index
    %c0_37 = arith.constant 0 : index
    %71 = vector.load %arg9[%c0_35, %c0_36, %c0_37] : memref<2x1x32xf32, #tpu.memory_space<vmem>>, vector<1x1x32xf32>
    %72 = vector.shape_cast %71 : vector<1x1x32xf32> to vector<1x32xf32>
    %73 = vector.broadcast %72 : vector<1x32xf32> to vector<16x32xf32>
    %74 = arith.addf %70, %73 : vector<16x32xf32>
    %75 = arith.addf %8, %74 : vector<16x32xf32>
    %c0_38 = arith.constant 0 : index
    %c0_39 = arith.constant 0 : index
    %c0_40 = arith.constant 0 : index
    %76 = vector.load %arg10[%c0_38, %c0_39, %c0_40] : memref<2x1x32xf32, #tpu.memory_space<vmem>>, vector<1x1x32xf32>
    %77 = vector.shape_cast %76 : vector<1x1x32xf32> to vector<1x32xf32>
    %c0_41 = arith.constant 0 : index
    %c0_42 = arith.constant 0 : index
    %c0_43 = arith.constant 0 : index
    %78 = vector.load %arg11[%c0_41, %c0_42, %c0_43] : memref<2x1x32xf32, #tpu.memory_space<vmem>>, vector<1x1x32xf32>
    %79 = vector.shape_cast %78 : vector<1x1x32xf32> to vector<1x32xf32>
    %cst_44 = arith.constant dense<0.000000e+00> : vector<16xf32>
    %80 = vector.multi_reduction <add>, %75, %cst_44 [1] : vector<16x32xf32> to vector<16xf32>
    %81 = vector.shape_cast %80 : vector<16xf32> to vector<16x1xf32>
    %cst_45 = arith.constant 3.200000e+01 : f32
    %82 = vector.broadcast %cst_45 : f32 to vector<16x1xf32>
    %83 = arith.divf %81, %82 : vector<16x1xf32>
    %84 = vector.broadcast %83 : vector<16x1xf32> to vector<16x32xf32>
    %85 = arith.subf %75, %84 : vector<16x32xf32>
    %86 = arith.mulf %85, %85 : vector<16x32xf32>
    %cst_46 = arith.constant dense<0.000000e+00> : vector<16xf32>
    %87 = vector.multi_reduction <add>, %86, %cst_46 [1] : vector<16x32xf32> to vector<16xf32>
    %88 = vector.shape_cast %87 : vector<16xf32> to vector<16x1xf32>
    %cst_47 = arith.constant 3.200000e+01 : f32
    %89 = vector.broadcast %cst_47 : f32 to vector<16x1xf32>
    %90 = arith.divf %88, %89 : vector<16x1xf32>
    %91 = vector.broadcast %83 : vector<16x1xf32> to vector<16x32xf32>
    %92 = arith.subf %75, %91 : vector<16x32xf32>
    %cst_48 = arith.constant 9.99999974E-6 : f32
    %93 = vector.broadcast %cst_48 : f32 to vector<16x1xf32>
    %94 = arith.addf %90, %93 : vector<16x1xf32>
    %95 = math.rsqrt %94 : vector<16x1xf32>
    %96 = vector.broadcast %95 : vector<16x1xf32> to vector<16x32xf32>
    %97 = arith.mulf %92, %96 : vector<16x32xf32>
    %98 = vector.broadcast %77 : vector<1x32xf32> to vector<16x32xf32>
    %99 = arith.mulf %97, %98 : vector<16x32xf32>
    %100 = vector.broadcast %79 : vector<1x32xf32> to vector<16x32xf32>
    %101 = arith.addf %99, %100 : vector<16x32xf32>
    %c0_49 = arith.constant 0 : index
    %c0_50 = arith.constant 0 : index
    %c0_51 = arith.constant 0 : index
    %102 = vector.load %arg12[%c0_49, %c0_50, %c0_51] : memref<2x32x64xf32, #tpu.memory_space<vmem>>, vector<1x32x64xf32>
    %103 = vector.shape_cast %102 : vector<1x32x64xf32> to vector<32x64xf32>
    %cst_52 = arith.constant dense<0.000000e+00> : vector<16x64xf32>
    %104 = tpu.matmul %101, %103, %cst_52 {dimension_numbers = #tpu.dot_dimension_numbers<[1], [0], [0], [1], [0, 0, 1, 1], [], []>} : vector<16x32xf32>, vector<32x64xf32>, vector<16x64xf32> -> vector<16x64xf32>
    %c0_53 = arith.constant 0 : index
    %c0_54 = arith.constant 0 : index
    %c0_55 = arith.constant 0 : index
    %105 = vector.load %arg13[%c0_53, %c0_54, %c0_55] : memref<2x1x64xf32, #tpu.memory_space<vmem>>, vector<1x1x64xf32>
    %106 = vector.shape_cast %105 : vector<1x1x64xf32> to vector<1x64xf32>
    %107 = vector.broadcast %106 : vector<1x64xf32> to vector<16x64xf32>
    %108 = arith.addf %104, %107 : vector<16x64xf32>
    %cst_56 = arith.constant 0.000000e+00 : f32
    %109 = vector.broadcast %cst_56 : f32 to vector<16x64xf32>
    %110 = arith.maximumf %108, %109 : vector<16x64xf32>
    %c0_57 = arith.constant 0 : index
    %c0_58 = arith.constant 0 : index
    %c0_59 = arith.constant 0 : index
    %111 = vector.load %arg14[%c0_57, %c0_58, %c0_59] : memref<2x64x32xf32, #tpu.memory_space<vmem>>, vector<1x64x32xf32>
    %112 = vector.shape_cast %111 : vector<1x64x32xf32> to vector<64x32xf32>
    %cst_60 = arith.constant dense<0.000000e+00> : vector<16x32xf32>
    %113 = tpu.matmul %110, %112, %cst_60 {dimension_numbers = #tpu.dot_dimension_numbers<[1], [0], [0], [1], [0, 0, 1, 1], [], []>} : vector<16x64xf32>, vector<64x32xf32>, vector<16x32xf32> -> vector<16x32xf32>
    %c0_61 = arith.constant 0 : index
    %c0_62 = arith.constant 0 : index
    %c0_63 = arith.constant 0 : index
    %114 = vector.load %arg15[%c0_61, %c0_62, %c0_63] : memref<2x1x32xf32, #tpu.memory_space<vmem>>, vector<1x1x32xf32>
    %115 = vector.shape_cast %114 : vector<1x1x32xf32> to vector<1x32xf32>
    %116 = vector.broadcast %115 : vector<1x32xf32> to vector<16x32xf32>
    %117 = arith.addf %113, %116 : vector<16x32xf32>
    %118 = arith.addf %101, %117 : vector<16x32xf32>
    %c0_64 = arith.constant 0 : index
    %c0_65 = arith.constant 0 : index
    %c0_66 = arith.constant 0 : index
    %119 = vector.load %arg16[%c0_64, %c0_65, %c0_66] : memref<2x1x32xf32, #tpu.memory_space<vmem>>, vector<1x1x32xf32>
    %120 = vector.shape_cast %119 : vector<1x1x32xf32> to vector<1x32xf32>
    %c0_67 = arith.constant 0 : index
    %c0_68 = arith.constant 0 : index
    %c0_69 = arith.constant 0 : index
    %121 = vector.load %arg17[%c0_67, %c0_68, %c0_69] : memref<2x1x32xf32, #tpu.memory_space<vmem>>, vector<1x1x32xf32>
    %122 = vector.shape_cast %121 : vector<1x1x32xf32> to vector<1x32xf32>
    %cst_70 = arith.constant dense<0.000000e+00> : vector<16xf32>
    %123 = vector.multi_reduction <add>, %118, %cst_70 [1] : vector<16x32xf32> to vector<16xf32>
    %124 = vector.shape_cast %123 : vector<16xf32> to vector<16x1xf32>
    %cst_71 = arith.constant 3.200000e+01 : f32
    %125 = vector.broadcast %cst_71 : f32 to vector<16x1xf32>
    %126 = arith.divf %124, %125 : vector<16x1xf32>
    %127 = vector.broadcast %126 : vector<16x1xf32> to vector<16x32xf32>
    %128 = arith.subf %118, %127 : vector<16x32xf32>
    %129 = arith.mulf %128, %128 : vector<16x32xf32>
    %cst_72 = arith.constant dense<0.000000e+00> : vector<16xf32>
    %130 = vector.multi_reduction <add>, %129, %cst_72 [1] : vector<16x32xf32> to vector<16xf32>
    %131 = vector.shape_cast %130 : vector<16xf32> to vector<16x1xf32>
    %cst_73 = arith.constant 3.200000e+01 : f32
    %132 = vector.broadcast %cst_73 : f32 to vector<16x1xf32>
    %133 = arith.divf %131, %132 : vector<16x1xf32>
    %134 = vector.broadcast %126 : vector<16x1xf32> to vector<16x32xf32>
    %135 = arith.subf %118, %134 : vector<16x32xf32>
    %cst_74 = arith.constant 9.99999974E-6 : f32
    %136 = vector.broadcast %cst_74 : f32 to vector<16x1xf32>
    %137 = arith.addf %133, %136 : vector<16x1xf32>
    %138 = math.rsqrt %137 : vector<16x1xf32>
    %139 = vector.broadcast %138 : vector<16x1xf32> to vector<16x32xf32>
    %140 = arith.mulf %135, %139 : vector<16x32xf32>
    %141 = vector.broadcast %120 : vector<1x32xf32> to vector<16x32xf32>
    %142 = arith.mulf %140, %141 : vector<16x32xf32>
    %143 = vector.broadcast %122 : vector<1x32xf32> to vector<16x32xf32>
    %144 = arith.addf %142, %143 : vector<16x32xf32>
    %c1 = arith.constant 1 : index
    %c0_75 = arith.constant 0 : index
    %c0_76 = arith.constant 0 : index
    %145 = vector.load %arg2[%c1, %c0_75, %c0_76] : memref<2x32x32xf32, #tpu.memory_space<vmem>>, vector<1x32x32xf32>
    %146 = vector.shape_cast %145 : vector<1x32x32xf32> to vector<32x32xf32>
    %cst_77 = arith.constant dense<0.000000e+00> : vector<16x32xf32>
    %147 = tpu.matmul %144, %146, %cst_77 {dimension_numbers = #tpu.dot_dimension_numbers<[1], [0], [0], [1], [0, 0, 1, 1], [], []>} : vector<16x32xf32>, vector<32x32xf32>, vector<16x32xf32> -> vector<16x32xf32>
    %c1_78 = arith.constant 1 : index
    %c0_79 = arith.constant 0 : index
    %c0_80 = arith.constant 0 : index
    %148 = vector.load %arg3[%c1_78, %c0_79, %c0_80] : memref<2x1x32xf32, #tpu.memory_space<vmem>>, vector<1x1x32xf32>
    %149 = vector.shape_cast %148 : vector<1x1x32xf32> to vector<1x32xf32>
    %150 = vector.broadcast %149 : vector<1x32xf32> to vector<16x32xf32>
    %151 = arith.addf %147, %150 : vector<16x32xf32>
    %c1_81 = arith.constant 1 : index
    %c0_82 = arith.constant 0 : index
    %c0_83 = arith.constant 0 : index
    %152 = vector.load %arg4[%c1_81, %c0_82, %c0_83] : memref<2x32x32xf32, #tpu.memory_space<vmem>>, vector<1x32x32xf32>
    %153 = vector.shape_cast %152 : vector<1x32x32xf32> to vector<32x32xf32>
    %cst_84 = arith.constant dense<0.000000e+00> : vector<16x32xf32>
    %154 = tpu.matmul %144, %153, %cst_84 {dimension_numbers = #tpu.dot_dimension_numbers<[1], [0], [0], [1], [0, 0, 1, 1], [], []>} : vector<16x32xf32>, vector<32x32xf32>, vector<16x32xf32> -> vector<16x32xf32>
    %c1_85 = arith.constant 1 : index
    %c0_86 = arith.constant 0 : index
    %c0_87 = arith.constant 0 : index
    %155 = vector.load %arg5[%c1_85, %c0_86, %c0_87] : memref<2x1x32xf32, #tpu.memory_space<vmem>>, vector<1x1x32xf32>
    %156 = vector.shape_cast %155 : vector<1x1x32xf32> to vector<1x32xf32>
    %157 = vector.broadcast %156 : vector<1x32xf32> to vector<16x32xf32>
    %158 = arith.addf %154, %157 : vector<16x32xf32>
    %c1_88 = arith.constant 1 : index
    %c0_89 = arith.constant 0 : index
    %c0_90 = arith.constant 0 : index
    %159 = vector.load %arg6[%c1_88, %c0_89, %c0_90] : memref<2x32x32xf32, #tpu.memory_space<vmem>>, vector<1x32x32xf32>
    %160 = vector.shape_cast %159 : vector<1x32x32xf32> to vector<32x32xf32>
    %cst_91 = arith.constant dense<0.000000e+00> : vector<16x32xf32>
    %161 = tpu.matmul %144, %160, %cst_91 {dimension_numbers = #tpu.dot_dimension_numbers<[1], [0], [0], [1], [0, 0, 1, 1], [], []>} : vector<16x32xf32>, vector<32x32xf32>, vector<16x32xf32> -> vector<16x32xf32>
    %c1_92 = arith.constant 1 : index
    %c0_93 = arith.constant 0 : index
    %c0_94 = arith.constant 0 : index
    %162 = vector.load %arg7[%c1_92, %c0_93, %c0_94] : memref<2x1x32xf32, #tpu.memory_space<vmem>>, vector<1x1x32xf32>
    %163 = vector.shape_cast %162 : vector<1x1x32xf32> to vector<1x32xf32>
    %164 = vector.broadcast %163 : vector<1x32xf32> to vector<16x32xf32>
    %165 = arith.addf %161, %164 : vector<16x32xf32>
    %166 = vector.shape_cast %151 : vector<16x32xf32> to vector<2x8x32xf32>
    %167 = vector.extract_strided_slice %166 {offsets = [0, 0, 0], sizes = [2, 8, 16], strides = [1, 1, 1]} : vector<2x8x32xf32> to vector<2x8x16xf32>
    %168 = vector.extract_strided_slice %166 {offsets = [0, 0, 16], sizes = [2, 8, 16], strides = [1, 1, 1]} : vector<2x8x32xf32> to vector<2x8x16xf32>
    %169 = tpu.concatenate %167, %168 in 0 : vector<2x8x16xf32>, vector<2x8x16xf32> -> vector<4x8x16xf32>
    %170 = vector.shape_cast %158 : vector<16x32xf32> to vector<2x8x32xf32>
    %171 = vector.extract_strided_slice %170 {offsets = [0, 0, 0], sizes = [2, 8, 16], strides = [1, 1, 1]} : vector<2x8x32xf32> to vector<2x8x16xf32>
    %172 = vector.extract_strided_slice %170 {offsets = [0, 0, 16], sizes = [2, 8, 16], strides = [1, 1, 1]} : vector<2x8x32xf32> to vector<2x8x16xf32>
    %173 = tpu.concatenate %171, %172 in 0 : vector<2x8x16xf32>, vector<2x8x16xf32> -> vector<4x8x16xf32>
    %174 = vector.shape_cast %165 : vector<16x32xf32> to vector<2x8x32xf32>
    %175 = vector.extract_strided_slice %174 {offsets = [0, 0, 0], sizes = [2, 8, 16], strides = [1, 1, 1]} : vector<2x8x32xf32> to vector<2x8x16xf32>
    %176 = vector.extract_strided_slice %174 {offsets = [0, 0, 16], sizes = [2, 8, 16], strides = [1, 1, 1]} : vector<2x8x32xf32> to vector<2x8x16xf32>
    %177 = tpu.concatenate %175, %176 in 0 : vector<2x8x16xf32>, vector<2x8x16xf32> -> vector<4x8x16xf32>
    "tpu.trace_start"() <{level = 10 : i32, message = "gqd,gkd->gqk"}> : () -> ()
    %cst_95 = arith.constant dense<0.000000e+00> : vector<4x8x8xf32>
    %178 = tpu.matmul %169, %173, %cst_95 {dimension_numbers = #tpu.dot_dimension_numbers<[2], [2], [1], [1], [0, 0, 0, 1, 1, 1], [0], [0]>} : vector<4x8x16xf32>, vector<4x8x16xf32>, vector<4x8x8xf32> -> vector<4x8x8xf32>
    "tpu.trace_stop"() : () -> ()
    %cst_96 = arith.constant 2.500000e-01 : f32
    %179 = vector.broadcast %cst_96 : f32 to vector<4x8x8xf32>
    %180 = arith.mulf %178, %179 : vector<4x8x8xf32>
    %181 = vector.shape_cast %14 : vector<8x8xf32> to vector<1x8x8xf32>
    %182 = vector.broadcast %181 : vector<1x8x8xf32> to vector<4x8x8xf32>
    %183 = arith.addf %180, %182 : vector<4x8x8xf32>
    %cst_97 = arith.constant dense<0xFF800000> : vector<4x8xf32>
    %184 = vector.multi_reduction <maximumf>, %183, %cst_97 [2] : vector<4x8x8xf32> to vector<4x8xf32>
    %185 = vector.shape_cast %184 : vector<4x8xf32> to vector<4x8x1xf32>
    %186 = vector.broadcast %185 : vector<4x8x1xf32> to vector<4x8x8xf32>
    %187 = arith.subf %183, %186 : vector<4x8x8xf32>
    %188 = math.exp %187 : vector<4x8x8xf32>
    %cst_98 = arith.constant dense<0.000000e+00> : vector<4x8xf32>
    %189 = vector.multi_reduction <add>, %188, %cst_98 [2] : vector<4x8x8xf32> to vector<4x8xf32>
    %190 = vector.shape_cast %189 : vector<4x8xf32> to vector<4x8x1xf32>
    %191 = vector.broadcast %190 : vector<4x8x1xf32> to vector<4x8x8xf32>
    %192 = arith.divf %188, %191 : vector<4x8x8xf32>
    "tpu.trace_start"() <{level = 10 : i32, message = "gqk,gkd->gqd"}> : () -> ()
    %cst_99 = arith.constant dense<0.000000e+00> : vector<4x8x16xf32>
    %193 = tpu.matmul %192, %177, %cst_99 {dimension_numbers = #tpu.dot_dimension_numbers<[2], [1], [1], [2], [0, 0, 0, 1, 1, 2], [0], [0]>} : vector<4x8x8xf32>, vector<4x8x16xf32>, vector<4x8x16xf32> -> vector<4x8x16xf32>
    "tpu.trace_stop"() : () -> ()
    %194 = vector.extract_strided_slice %193 {offsets = [0, 0, 0], sizes = [2, 8, 16], strides = [1, 1, 1]} : vector<4x8x16xf32> to vector<2x8x16xf32>
    %195 = vector.extract_strided_slice %193 {offsets = [2, 0, 0], sizes = [2, 8, 16], strides = [1, 1, 1]} : vector<4x8x16xf32> to vector<2x8x16xf32>
    %196 = tpu.concatenate %194, %195 in 2 : vector<2x8x16xf32>, vector<2x8x16xf32> -> vector<2x8x32xf32>
    %197 = vector.shape_cast %196 : vector<2x8x32xf32> to vector<16x32xf32>
    %c1_100 = arith.constant 1 : index
    %c0_101 = arith.constant 0 : index
    %c0_102 = arith.constant 0 : index
    %198 = vector.load %arg8[%c1_100, %c0_101, %c0_102] : memref<2x32x32xf32, #tpu.memory_space<vmem>>, vector<1x32x32xf32>
    %199 = vector.shape_cast %198 : vector<1x32x32xf32> to vector<32x32xf32>
    %cst_103 = arith.constant dense<0.000000e+00> : vector<16x32xf32>
    %200 = tpu.matmul %197, %199, %cst_103 {dimension_numbers = #tpu.dot_dimension_numbers<[1], [0], [0], [1], [0, 0, 1, 1], [], []>} : vector<16x32xf32>, vector<32x32xf32>, vector<16x32xf32> -> vector<16x32xf32>
    %c1_104 = arith.constant 1 : index
    %c0_105 = arith.constant 0 : index
    %c0_106 = arith.constant 0 : index
    %201 = vector.load %arg9[%c1_104, %c0_105, %c0_106] : memref<2x1x32xf32, #tpu.memory_space<vmem>>, vector<1x1x32xf32>
    %202 = vector.shape_cast %201 : vector<1x1x32xf32> to vector<1x32xf32>
    %203 = vector.broadcast %202 : vector<1x32xf32> to vector<16x32xf32>
    %204 = arith.addf %200, %203 : vector<16x32xf32>
    %205 = arith.addf %144, %204 : vector<16x32xf32>
    %c1_107 = arith.constant 1 : index
    %c0_108 = arith.constant 0 : index
    %c0_109 = arith.constant 0 : index
    %206 = vector.load %arg10[%c1_107, %c0_108, %c0_109] : memref<2x1x32xf32, #tpu.memory_space<vmem>>, vector<1x1x32xf32>
    %207 = vector.shape_cast %206 : vector<1x1x32xf32> to vector<1x32xf32>
    %c1_110 = arith.constant 1 : index
    %c0_111 = arith.constant 0 : index
    %c0_112 = arith.constant 0 : index
    %208 = vector.load %arg11[%c1_110, %c0_111, %c0_112] : memref<2x1x32xf32, #tpu.memory_space<vmem>>, vector<1x1x32xf32>
    %209 = vector.shape_cast %208 : vector<1x1x32xf32> to vector<1x32xf32>
    %cst_113 = arith.constant dense<0.000000e+00> : vector<16xf32>
    %210 = vector.multi_reduction <add>, %205, %cst_113 [1] : vector<16x32xf32> to vector<16xf32>
    %211 = vector.shape_cast %210 : vector<16xf32> to vector<16x1xf32>
    %cst_114 = arith.constant 3.200000e+01 : f32
    %212 = vector.broadcast %cst_114 : f32 to vector<16x1xf32>
    %213 = arith.divf %211, %212 : vector<16x1xf32>
    %214 = vector.broadcast %213 : vector<16x1xf32> to vector<16x32xf32>
    %215 = arith.subf %205, %214 : vector<16x32xf32>
    %216 = arith.mulf %215, %215 : vector<16x32xf32>
    %cst_115 = arith.constant dense<0.000000e+00> : vector<16xf32>
    %217 = vector.multi_reduction <add>, %216, %cst_115 [1] : vector<16x32xf32> to vector<16xf32>
    %218 = vector.shape_cast %217 : vector<16xf32> to vector<16x1xf32>
    %cst_116 = arith.constant 3.200000e+01 : f32
    %219 = vector.broadcast %cst_116 : f32 to vector<16x1xf32>
    %220 = arith.divf %218, %219 : vector<16x1xf32>
    %221 = vector.broadcast %213 : vector<16x1xf32> to vector<16x32xf32>
    %222 = arith.subf %205, %221 : vector<16x32xf32>
    %cst_117 = arith.constant 9.99999974E-6 : f32
    %223 = vector.broadcast %cst_117 : f32 to vector<16x1xf32>
    %224 = arith.addf %220, %223 : vector<16x1xf32>
    %225 = math.rsqrt %224 : vector<16x1xf32>
    %226 = vector.broadcast %225 : vector<16x1xf32> to vector<16x32xf32>
    %227 = arith.mulf %222, %226 : vector<16x32xf32>
    %228 = vector.broadcast %207 : vector<1x32xf32> to vector<16x32xf32>
    %229 = arith.mulf %227, %228 : vector<16x32xf32>
    %230 = vector.broadcast %209 : vector<1x32xf32> to vector<16x32xf32>
    %231 = arith.addf %229, %230 : vector<16x32xf32>
    %c1_118 = arith.constant 1 : index
    %c0_119 = arith.constant 0 : index
    %c0_120 = arith.constant 0 : index
    %232 = vector.load %arg12[%c1_118, %c0_119, %c0_120] : memref<2x32x64xf32, #tpu.memory_space<vmem>>, vector<1x32x64xf32>
    %233 = vector.shape_cast %232 : vector<1x32x64xf32> to vector<32x64xf32>
    %cst_121 = arith.constant dense<0.000000e+00> : vector<16x64xf32>
    %234 = tpu.matmul %231, %233, %cst_121 {dimension_numbers = #tpu.dot_dimension_numbers<[1], [0], [0], [1], [0, 0, 1, 1], [], []>} : vector<16x32xf32>, vector<32x64xf32>, vector<16x64xf32> -> vector<16x64xf32>
    %c1_122 = arith.constant 1 : index
    %c0_123 = arith.constant 0 : index
    %c0_124 = arith.constant 0 : index
    %235 = vector.load %arg13[%c1_122, %c0_123, %c0_124] : memref<2x1x64xf32, #tpu.memory_space<vmem>>, vector<1x1x64xf32>
    %236 = vector.shape_cast %235 : vector<1x1x64xf32> to vector<1x64xf32>
    %237 = vector.broadcast %236 : vector<1x64xf32> to vector<16x64xf32>
    %238 = arith.addf %234, %237 : vector<16x64xf32>
    %cst_125 = arith.constant 0.000000e+00 : f32
    %239 = vector.broadcast %cst_125 : f32 to vector<16x64xf32>
    %240 = arith.maximumf %238, %239 : vector<16x64xf32>
    %c1_126 = arith.constant 1 : index
    %c0_127 = arith.constant 0 : index
    %c0_128 = arith.constant 0 : index
    %241 = vector.load %arg14[%c1_126, %c0_127, %c0_128] : memref<2x64x32xf32, #tpu.memory_space<vmem>>, vector<1x64x32xf32>
    %242 = vector.shape_cast %241 : vector<1x64x32xf32> to vector<64x32xf32>
    %cst_129 = arith.constant dense<0.000000e+00> : vector<16x32xf32>
    %243 = tpu.matmul %240, %242, %cst_129 {dimension_numbers = #tpu.dot_dimension_numbers<[1], [0], [0], [1], [0, 0, 1, 1], [], []>} : vector<16x64xf32>, vector<64x32xf32>, vector<16x32xf32> -> vector<16x32xf32>
    %c1_130 = arith.constant 1 : index
    %c0_131 = arith.constant 0 : index
    %c0_132 = arith.constant 0 : index
    %244 = vector.load %arg15[%c1_130, %c0_131, %c0_132] : memref<2x1x32xf32, #tpu.memory_space<vmem>>, vector<1x1x32xf32>
    %245 = vector.shape_cast %244 : vector<1x1x32xf32> to vector<1x32xf32>
    %246 = vector.broadcast %245 : vector<1x32xf32> to vector<16x32xf32>
    %247 = arith.addf %243, %246 : vector<16x32xf32>
    %248 = arith.addf %231, %247 : vector<16x32xf32>
    %c1_133 = arith.constant 1 : index
    %c0_134 = arith.constant 0 : index
    %c0_135 = arith.constant 0 : index
    %249 = vector.load %arg16[%c1_133, %c0_134, %c0_135] : memref<2x1x32xf32, #tpu.memory_space<vmem>>, vector<1x1x32xf32>
    %250 = vector.shape_cast %249 : vector<1x1x32xf32> to vector<1x32xf32>
    %c1_136 = arith.constant 1 : index
    %c0_137 = arith.constant 0 : index
    %c0_138 = arith.constant 0 : index
    %251 = vector.load %arg17[%c1_136, %c0_137, %c0_138] : memref<2x1x32xf32, #tpu.memory_space<vmem>>, vector<1x1x32xf32>
    %252 = vector.shape_cast %251 : vector<1x1x32xf32> to vector<1x32xf32>
    %cst_139 = arith.constant dense<0.000000e+00> : vector<16xf32>
    %253 = vector.multi_reduction <add>, %248, %cst_139 [1] : vector<16x32xf32> to vector<16xf32>
    %254 = vector.shape_cast %253 : vector<16xf32> to vector<16x1xf32>
    %cst_140 = arith.constant 3.200000e+01 : f32
    %255 = vector.broadcast %cst_140 : f32 to vector<16x1xf32>
    %256 = arith.divf %254, %255 : vector<16x1xf32>
    %257 = vector.broadcast %256 : vector<16x1xf32> to vector<16x32xf32>
    %258 = arith.subf %248, %257 : vector<16x32xf32>
    %259 = arith.mulf %258, %258 : vector<16x32xf32>
    %cst_141 = arith.constant dense<0.000000e+00> : vector<16xf32>
    %260 = vector.multi_reduction <add>, %259, %cst_141 [1] : vector<16x32xf32> to vector<16xf32>
    %261 = vector.shape_cast %260 : vector<16xf32> to vector<16x1xf32>
    %cst_142 = arith.constant 3.200000e+01 : f32
    %262 = vector.broadcast %cst_142 : f32 to vector<16x1xf32>
    %263 = arith.divf %261, %262 : vector<16x1xf32>
    %264 = vector.broadcast %256 : vector<16x1xf32> to vector<16x32xf32>
    %265 = arith.subf %248, %264 : vector<16x32xf32>
    %cst_143 = arith.constant 9.99999974E-6 : f32
    %266 = vector.broadcast %cst_143 : f32 to vector<16x1xf32>
    %267 = arith.addf %263, %266 : vector<16x1xf32>
    %268 = math.rsqrt %267 : vector<16x1xf32>
    %269 = vector.broadcast %268 : vector<16x1xf32> to vector<16x32xf32>
    %270 = arith.mulf %265, %269 : vector<16x32xf32>
    %271 = vector.broadcast %250 : vector<1x32xf32> to vector<16x32xf32>
    %272 = arith.mulf %270, %271 : vector<16x32xf32>
    %273 = vector.broadcast %252 : vector<1x32xf32> to vector<16x32xf32>
    %274 = arith.addf %272, %273 : vector<16x32xf32>
    %c0_144 = arith.constant 0 : index
    %c0_145 = arith.constant 0 : index
    %275 = vector.load %arg18[%c0_144, %c0_145] : memref<32x128xf32, #tpu.memory_space<vmem>>, vector<32x128xf32>
    %cst_146 = arith.constant dense<0.000000e+00> : vector<16x128xf32>
    %276 = tpu.matmul %274, %275, %cst_146 {dimension_numbers = #tpu.dot_dimension_numbers<[1], [0], [0], [1], [0, 0, 1, 1], [], []>} : vector<16x32xf32>, vector<32x128xf32>, vector<16x128xf32> -> vector<16x128xf32>
    %c0_147 = arith.constant 0 : index
    %c0_148 = arith.constant 0 : index
    %277 = vector.load %arg19[%c0_147, %c0_148] : memref<1x128xf32, #tpu.memory_space<vmem>>, vector<1x128xf32>
    %278 = vector.broadcast %277 : vector<1x128xf32> to vector<16x128xf32>
    %279 = arith.addf %276, %278 : vector<16x128xf32>
    %cst_149 = arith.constant dense<0xFF800000> : vector<16xf32>
    %280 = vector.multi_reduction <maximumf>, %279, %cst_149 [1] : vector<16x128xf32> to vector<16xf32>
    %281 = vector.shape_cast %280 : vector<16xf32> to vector<16x1xf32>
    %282 = vector.broadcast %281 : vector<16x1xf32> to vector<16x128xf32>
    %283 = arith.subf %279, %282 : vector<16x128xf32>
    %284 = math.exp %283 : vector<16x128xf32>
    %cst_150 = arith.constant dense<0.000000e+00> : vector<16xf32>
    %285 = vector.multi_reduction <add>, %284, %cst_150 [1] : vector<16x128xf32> to vector<16xf32>
    %286 = vector.shape_cast %285 : vector<16xf32> to vector<16x1xf32>
    %287 = math.log %286 : vector<16x1xf32>
    %288 = vector.broadcast %287 : vector<16x1xf32> to vector<16x128xf32>
    %289 = arith.subf %283, %288 : vector<16x128xf32>
    %c0_151 = arith.constant 0 : index
    %c0_152 = arith.constant 0 : index
    %290 = vector.load %arg20[%c0_151, %c0_152] : memref<16x128xf32, #tpu.memory_space<vmem>>, vector<16x128xf32>
    tpu.vector_store %arg20[%c0_151, %c0_152], %289 {strides = array<i32>} : memref<16x128xf32, #tpu.memory_space<vmem>>, vector<16x128xf32>,
    return
  }
}

</mosaic_0001>

<bundles_post_ra>
// kernel: transformer_forward.1
= control target key start
LH: loop header
LB: loop body
LE: loop exit
PB: predicated region body
PF: predicated region fallthrough
CT: control target
= control target key end

     0   :  { %vm89_vm0 = vcmask 261120   ;;  %v3480_v19 = vmov 0.0   ;;  %vm3481_vm1 = vmmov 0   ;;  %vm363_vm2 = vcmask 130048   ;;  %s4036_s4 = inlined_call_operand.vmem [shape: f32[2,32,32], index: 4, kind: input, shape index: {}]   ;;  %s4037_s2 = inlined_call_operand.vmem [shape: f32[2,32,32], index: 2, kind: input, shape index: {}]   ;;  %s4038_s0 = inlined_call_operand.vmem [shape: f32[16,32], index: 0, kind: input, shape index: {}]   ;;  %s4039_s1 = inlined_call_operand.vmem [shape: f32[8,32], index: 1, kind: input, shape index: {}]   ;;  %s4040_s5 = inlined_call_operand.vmem [shape: f32[2,1,32], index: 5, kind: input, shape index: {}]   ;;  %s4041_s3 = inlined_call_operand.vmem [shape: f32[2,1,32], index: 3, kind: input, shape index: {}]   ;;  %s4042_s6 = inlined_call_operand.vmem [shape: f32[2,32,32], index: 6, kind: input, shape index: {}]   ;;  %s4043_s7 = inlined_call_operand.vmem [shape: f32[2,1,32], index: 7, kind: input, shape index: {}]   ;;  %s4044_s8 = inlined_call_operand.vmem [shape: f32[2,32,32], index: 8, kind: input, shape index: {}]   ;;  %s4045_s9 = inlined_call_operand.vmem [shape: f32[2,1,32], index: 9, kind: input, shape index: {}]   ;;  %s4046_s12 = inlined_call_operand.vmem [shape: f32[2,32,64], index: 12, kind: input, shape index: {}]   ;;  %s4047_s14 = inlined_call_operand.vmem [shape: f32[2,64,32], index: 14, kind: input, shape index: {}]   ;;  %s4048_s10 = inlined_call_operand.vmem [shape: f32[2,1,32], index: 10, kind: input, shape index: {}]   ;;  %s4049_s11 = inlined_call_operand.vmem [shape: f32[2,1,32], index: 11, kind: input, shape index: {}]   ;;  %s4050_s13 = inlined_call_operand.vmem [shape: f32[2,1,64], index: 13, kind: input, shape index: {}]   ;;  %s4051_s15 = inlined_call_operand.vmem [shape: f32[2,1,32], index: 15, kind: input, shape index: {}]   ;;  %s4052_s16 = inlined_call_operand.vmem [shape: f32[2,1,32], index: 16, kind: input, shape index: {}]   ;;  %s4053_s17 = inlined_call_operand.vmem [shape: f32[2,1,32], index: 17, kind: input, shape index: {}]   ;;  %s4054_s18 = inlined_call_operand.vmem [shape: f32[32,128], index: 18, kind: input, shape index: {}]   ;;  %s4055_s19 = inlined_call_operand.vmem [shape: f32[1,128], index: 19, kind: input, shape index: {}]   ;;  %s4056_s20 = inlined_call_operand.vmem [shape: f32[16,128], index: 20, kind: output, shape index: {}]  }
   0x1   :  { %4061 = sst [smem:[#allocation2_spill]] %s4036_s4  ;;  %v2833_v22 = vld [vmem:[%s4041_s3] ss:$0 sm:$0xff]  ;;  %v258_v31 = vld [vmem:[%s4042_s6 + $0x8] sm:$0xff]  ;;  %v259_v32 = vld [vmem:[%s4042_s6 + $0x10] sm:$0xff]  ;;  %v72_v40 = vlaneseq  ;;  %vm668_vm4 = vcmask 64512  }
   0x2   :  { %4062 = sst [smem:[#allocation3_spill]] %s4037_s2  ;;  %s4066_s23 = sld [smem:[#allocation2_spill]]  ;;  %v257_v30 = vld [vmem:[%s4042_s6] sm:$0xff]  ;;  %v260_v34 = vld [vmem:[%s4042_s6 + $0x18] sm:$0xff]  ;;  %v3483_v44 = vmov -1e+30  }
   0x3   :  { %4063 = sst [smem:[#allocation4_spill]] %s4038_s0  ;;  %s4067_s26 = sld [smem:[#allocation3_spill]]  ;;  %v3315_v33 = vpack.c.bf16 %v258_v31, %v257_v30  ;;  %v3319_v35 = vpack.c.bf16 %v260_v34, %v259_v32  ;;  %v73_v41 = vshrl.u32 %v72_v40, 7  ;;  %v75_v42 = vand.u32 127, %v72_v40 }
   0x4   :  { %4064 = sst [smem:[#allocation5_spill]] %s4039_s1  ;;  %s4068_s1 = sld [smem:[#allocation4_spill]]  ;;  %vm1263_vm5 = vcmask 523264  }
   0x5   :  { %4065 = sst [smem:[#allocation6_spill]] %s4040_s5  ;;  %s4069_s5 = sld [smem:[#allocation5_spill]]  ;;  %vm76_vm3 = vcmp.le.s32.totalorder %v75_v42, %v73_v41 }
   0x6   :  { %s4070_s2 = sld [smem:[#allocation6_spill]]  ;;  %s3482_s0 = smov 112   ;;  %v3687_v45 = vsel %vm76_vm3, 0.0, %v3483_v44  ;;  %v1016_v44 = vld [vmem:[%s4044_s8 + $0x8] sm:$0xff] }
   0x7   :  { %s3484_s4 = smov 16  }
   0x8   :  { %v171_v0 = vld [vmem:[%s4066_s23] sm:$0xff]  ;;  %v172_v1 = vld [vmem:[%s4066_s23 + $0x8] sm:$0xff]  ;;  %v173_v5 = vld [vmem:[%s4066_s23 + $0x10] sm:$0xff] }
   0x9   :  { %v78_v2 = vld [vmem:[%s4067_s26] sm:$0xff]  ;;  %v3307_v3 = vpack.c.bf16 %v172_v1, %v171_v0  ;;  %v79_v4 = vld [vmem:[%s4067_s26 + $0x8] sm:$0xff]  ;;  %v174_v6 = vld [vmem:[%s4066_s23 + $0x18] sm:$0xff] }
   0xa   :  { %v3299_v7 = vpack.c.bf16 %v79_v4, %v78_v2  ;;  %v3311_v8 = vpack.c.bf16 %v174_v6, %v173_v5  ;;  %v80_v9 = vld [vmem:[%s4067_s26 + $0x10] sm:$0xff]  ;;  %v81_v10 = vld [vmem:[%s4067_s26 + $0x18] sm:$0xff]  ;;  %v65_v11 = vld [vmem:[%s4068_s1] sm:$0xff] }
   0xb   :  { %3308 = vmatprep.subr.bf16.mxu1 %v3307_v3  ;;  %v3303_v12 = vpack.c.bf16 %v81_v10, %v80_v9  ;;  %v67_v13 = vmul.f32 5.656854, %v65_v11  ;;  %v69_v14 = vld [vmem:[%s4069_s5] sm:$0xff]  ;;  %v66_v15 = vld [vmem:[%s4068_s1 + $0x8] sm:$0xff] }
   0xc   :  { %3310 = vmatpush3.bf16.msra.mxu1 %v3307_v3  ;;  %3300 = vmatprep.subr.bf16.mxu0 %v3299_v7  ;;  %v68_v16 = vmul.f32 5.656854, %v66_v15  ;;  %v2836_v20 = vld [vmem:[%s4070_s2] ss:$0 sm:$0xff] }
   0xd   :  { %3302 = vmatpush3.bf16.msra.mxu0 %v3299_v7  ;;  %3312 = vmatprep.subr.bf16.mxu1 %v3311_v8  ;;  %v3623_v17 = vadd.f32 %v69_v14, %v67_v13 }
   0xe   :  { %3304 = vmatprep.subr.bf16.mxu0 %v3303_v12  ;;  %v3627_v18 = vadd.f32 %v69_v14, %v68_v16 }
   0xf   :  { %3079 = vmatprep.mubr.msk.f32.mxu1 %vm89_vm0, %v3623_v17  ;;  %3068 = vmatprep.mubr.msk.f32.mxu0 %vm89_vm0, %v3623_v17 }
  0x10   :  { %3314 = vmatpush3.bf16.msra.mxu1 %v3311_v8 }
  0x11   :  { %3306 = vmatpush3.bf16.msra.mxu0 %v3303_v12  ;;  %3093 = vmatprep.subr.mxu1 %v3480_v19  ;;  %v2839_v12 = vld [vmem:[%s4043_s7] ss:$0 sm:$0xff] }
  0x12   :  { %3316 = vmatprep.subr.bf16.mxu0 %v3315_v33 }
  0x13   :  { %3080 = vmatmul.mubr.msk.f32.vlgmr.msra.gmra.mrb[0].mxu1 %vm89_vm0, %v3627_v18 }
  0x14   :  { %3069 = vmatmul.mubr.msk.f32.vlgmr.msra.gmra.mrb[0].mxu0 %vm89_vm0, %v3627_v18  ;;  %3095 = vmatprep.mubr.msk.f32.mxu1 %vm3481_vm1, %v3480_v19 }
  0x15   :  { %3090 = vmatprep.mubr.msk.f32.mxu0 %vm89_vm0, %v3623_v17  ;;  %3318 = vmatpush3.bf16.msra.mxu0 %v3315_v33 }
  0x16   :  { %3320 = vmatprep.subr.bf16.mxu0 %v3319_v35 }
  0x19   :  { %3322 = vmatpush3.bf16.msra.mxu0 %v3319_v35 }
  0x1a   :  { %3113 = vmatprep.subr.mxu0 %v3480_v19 }
  0x1c   :  { %3091 = vmatmul.mubr.msk.f32.vlgmr.msra.gmra.mrb[2].mxu0 %vm89_vm0, %v3627_v18 }
  0x1d   :  { %3115 = vmatprep.mubr.msk.f32.mxu0 %vm3481_vm1, %v3480_v19 }
  0xe6   :  { %v3081_v21 = vpop.f32.mrb[0].mxu1 }
  0xe7   :  { %v254_v23 = vadd.f32 %v3081_v21, %v2836_v20  ;;  %v248_v24 = vpop.f32.mrb[1].mxu1  ;;  %v3070_v25 = vpop.f32.mrb[0].mxu0 }
  0xe8   :  { %v249_v26 = vadd.f32 %v2836_v20, %v248_v24  ;;  %v162_v27 = vpop.f32.mrb[1].mxu0  ;;  %v168_v28 = vadd.f32 %v3070_v25, %v2833_v22 }
  0xe9   :  { %353 = vrot.lane.b32.xlu1 %v254_v23, %s3482_s0  ;;  %v163_v29 = vadd.f32 %v2833_v22, %v162_v27 }
  0xea   :  { %351 = vrot.lane.b32.xlu0 %v249_v26, %s3482_s0  ;;  %3094 = vmatpush3.xpose.msk.msra.mxu1 %vm363_vm2, %v249_v26 }
  0xeb   :  { %3098 = vmatprep.subr.mxu1 %v3480_v19 }
  0xed   :  { %347 = vrot.lane.b32.xlu1 %v168_v28, %s3482_s0  ;;  %3096 = vmatmul.mubr.msk.f32.vlgmr.msra.gmra.mrb[2].mxu1 %vm363_vm2, %v163_v29 }
  0xee   :  { %345 = vrot.lane.b32.xlu0 %v163_v29, %s3482_s0  ;;  %3099 = vmatpush3.xpose.msk.msra.mxu1 %vm363_vm2, %v254_v23 }
  0xef   :  { %3100 = vmatprep.mubr.msk.f32.mxu1 %vm3481_vm1, %v3480_v19  ;;  %3103 = vmatprep.subr.mxu1 %v3480_v19  ;;  %v3092_v11 = vpop.f32.mrb[2].mxu0 }
  0xf0   :  { %v334_v13 = vpop.f32.mrb[3].mxu0  ;;  %v340_v14 = vadd.f32 %v3092_v11, %v2839_v12 }
  0xf1   :  { %3101 = vmatmul.mubr.msk.f32.vlgmr.msra.gmra.mrb[4].mxu1 %vm363_vm2, %v168_v28  ;;  %v335_v15 = vadd.f32 %v2839_v12, %v334_v13 }
  0xf2   :  { %3105 = vmatprep.mubr.msk.f32.mxu1 %vm3481_vm1, %v3480_v19 }
  0xf3   :  { %3114 = vmatpush3.msra.mxu0 %v335_v15 }
  0xf4   :  { %3123 = vmatprep.subr.mxu0 %v3480_v19 }
 0x15b   :  { %v354_v37 = vpop.permute.xlu1 %353 }
 0x15c   :  { %v352_v36 = vpop.permute.xlu0 %351 }
 0x15d   :  { %3104 = vmatpush3.xpose.msk.msra.mxu1 %vm363_vm2, %v352_v36 }
 0x15e   :  { %3108 = vmatprep.subr.mxu1 %v3480_v19 }
 0x15f   :  { %v348_v39 = vpop.permute.xlu1 %347 }
 0x160   :  { %v346_v38 = vpop.permute.xlu0 %345 }
 0x161   :  { %3106 = vmatmul.mubr.msk.f32.vlgmr.msra.gmra.mrb[6].mxu1 %vm363_vm2, %v346_v38 }
 0x162   :  { %3109 = vmatpush3.xpose.msk.msra.mxu1 %vm363_vm2, %v354_v37  ;;  %3110 = vmatprep.mubr.msk.f32.mxu1 %vm3481_vm1, %v3480_v19 }
 0x163   :  { %3118 = vmatprep.subr.mxu1 %v3480_v19 }
 0x165   :  { %3111 = vmatmul.mubr.msk.f32.vlgmr.msra.gmra.mrb[8].mxu1 %vm363_vm2, %v348_v39 }
 0x166   :  { %3120 = vmatprep.mubr.msk.f32.mxu1 %vm3481_vm1, %v3480_v19  ;;  %3119 = vmatpush3.msra.mxu1 %v340_v14 }
 0x167   :  { %3128 = vmatprep.subr.mxu1 %v3480_v19 }
 0x1c0   :  { %v434_v43 = vpop.f32.mrb[2].mxu1 }
 0x1c1   :  { %v660_v46 = vmul.f32 0.25, %v434_v43  ;;  %v3097_v47 = vpop.f32.mrb[3].mxu1  ;;  %v1015_v43 = vld [vmem:[%s4044_s8] sm:$0xff] }
 0x1c3   :  { %v664_v48 = vadd.f32 %v660_v46, %v3687_v45  ;;  %v3323_v46 = vpack.c.bf16 %v1016_v44, %v1015_v43 }
 0x1c4   :  { %v508_v49 = vpop.f32.mrb[4].mxu1 }
 0x1c5   :  { %v661_v50 = vmul.f32 0.25, %v508_v49  ;;  %v3102_v51 = vpop.f32.mrb[5].mxu1  ;;  %v669_v52 = vsel %vm668_vm4, %v664_v48, -inf }
 0x1c6   :  { %670 = vmax.xlane.f32.xlu0 %v669_v52  ;;  %v1017_v51 = vld [vmem:[%s4044_s8 + $0x10] sm:$0xff]  ;;  %v1018_v52 = vld [vmem:[%s4044_s8 + $0x18] sm:$0xff] }
 0x1c7   :  { %v665_v53 = vadd.f32 %v661_v50, %v3687_v45 }
 0x1c9   :  { %v672_v54 = vsel %vm668_vm4, %v665_v53, -inf }
 0x1ca   :  { %673 = vmax.xlane.f32.xlu1 %v672_v54 }
 0x234   :  { %v582_v55 = vpop.f32.mrb[6].mxu1 }
 0x235   :  { %v662_v56 = vmul.f32 0.25, %v582_v55  ;;  %v3107_v57 = vpop.f32.mrb[7].mxu1 }
 0x237   :  { %v666_v58 = vadd.f32 %v662_v56, %v3687_v45 }
 0x238   :  { %v656_v59 = vpop.f32.mrb[8].mxu1 }
 0x239   :  { %v663_v60 = vmul.f32 0.25, %v656_v59  ;;  %v3112_v61 = vpop.f32.mrb[9].mxu1  ;;  %v675_v62 = vsel %vm668_vm4, %v666_v58, -inf }
 0x23a   :  { %676 = vmax.xlane.f32.xlu0 %v675_v62  ;;  %v2854_v62 = vld [vmem:[%s4045_s9] ss:$0 sm:$0xff] }
 0x23b   :  { %v667_v63 = vadd.f32 %v663_v60, %v3687_v45 }
 0x23d   :  { %v678_v0 = vsel %vm668_vm4, %v667_v63, -inf }
 0x23e   :  { %679 = vmax.xlane.f32.xlu0 %v678_v0 }
 0x253   :  { %v671_v1 = vpop.xlane.xlu0 %670 }
 0x254   :  { %v681_v2 = vsub.f32 %v664_v48, %v671_v1 }
 0x256   :  { %v685_v3 = vmul.f32 1.442695, %v681_v2 }
 0x257   :  { %v674_v4 = vpop.xlane.xlu1 %673 }
 0x258   :  { %3424 = vpow2.f32 %v685_v3  ;;  %v682_v5 = vsub.f32 %v665_v53, %v674_v4  ;;  %v3327_v53 = vpack.c.bf16 %v1018_v52, %v1017_v51  ;;  %v1255_v51 = vld [vmem:[%s4047_s14 + $0x38] sm:$0xff] }
 0x25a   :  { %v687_v6 = vmul.f32 1.442695, %v682_v5 }
 0x25c   :  { %3426 = vpow2.f32 %v687_v6 }
 0x262   :  { %v3425_v7 = vpop.eup %3424 }
 0x263   :  { %v693_v8 = vsel %vm668_vm4, %v3425_v7, 0.0 }
 0x264   :  { %694 = vadd.xlane.f32.xlu1 %v693_v8 }
 0x266   :  { %v3427_v9 = vpop.eup %3426 }
 0x267   :  { %v696_v10 = vsel %vm668_vm4, %v3427_v9, 0.0 }
 0x268   :  { %697 = vadd.xlane.f32.xlu0 %v696_v10 }
 0x2c7   :  { %v677_v16 = vpop.xlane.xlu0 %676 }
 0x2c8   :  { %v683_v20 = vsub.f32 %v666_v58, %v677_v16  ;;  %v1155_v16 = vld [vmem:[%s4046_s12 + $0x8] sm:$0xff] }
 0x2ca   :  { %v689_v21 = vmul.f32 1.442695, %v683_v20 }
 0x2cb   :  { %v680_v22 = vpop.xlane.xlu0 %679 }
 0x2cc   :  { %3428 = vpow2.f32 %v689_v21  ;;  %v684_v23 = vsub.f32 %v667_v63, %v680_v22  ;;  %v1156_v21 = vld [vmem:[%s4046_s12 + $0x10] sm:$0xff]  ;;  %v1157_v22 = vld [vmem:[%s4046_s12 + $0x18] sm:$0xff] }
 0x2ce   :  { %v691_v24 = vmul.f32 1.442695, %v684_v23  ;;  %v3335_v23 = vpack.c.bf16 %v1157_v22, %v1156_v21  ;;  %v2869_v22 = vld [vmem:[%s4067_s26 + $0x30] sm:$0xff] }
 0x2d0   :  { %3430 = vpow2.f32 %v691_v24  ;;  %v1248_v24 = vld [vmem:[%s4047_s14] sm:$0xff] }
 0x2d6   :  { %v3429_v25 = vpop.eup %3428 }
 0x2d7   :  { %v699_v26 = vsel %vm668_vm4, %v3429_v25, 0.0 }
 0x2d8   :  { %700 = vadd.xlane.f32.xlu1 %v699_v26  ;;  %v1250_v26 = vld [vmem:[%s4047_s14 + $0x10] sm:$0xff] }
 0x2da   :  { %v3431_v27 = vpop.eup %3430 }
 0x2db   :  { %v702_v28 = vsel %vm668_vm4, %v3431_v27, 0.0 }
 0x2dc   :  { %703 = vadd.xlane.f32.xlu0 %v702_v28  ;;  %v1251_v28 = vld [vmem:[%s4047_s14 + $0x18] sm:$0xff] }
 0x2e9   :  { %357 = vrot.lane.b32.xlu1 %v335_v15, %s3482_s0 }
 0x2f1   :  { %v695_v29 = vpop.xlane.xlu1 %694 }
 0x2f2   :  { %3432 = vrcp.f32 %v695_v29  ;;  %359 = vrot.lane.b32.xlu0 %v340_v14, %s3482_s0  ;;  %v3343_v29 = vpack.c.bf16 %v1251_v28, %v1250_v26  ;;  %v2886_v26 = vld [vmem:[%s4042_s6 + $0x38] sm:$0xff]  ;;  %v2875_v28 = vld [vmem:[%s4066_s23 + $0x20] sm:$0xff] }
 0x2f5   :  { %v698_v30 = vpop.xlane.xlu0 %697 }
 0x2f6   :  { %3434 = vrcp.f32 %v698_v30  ;;  %v1252_v30 = vld [vmem:[%s4047_s14 + $0x20] sm:$0xff] }
 0x2fc   :  { %v3433_v31 = vpop.eup %3432 }
 0x2fd   :  { %v706_v32 = vmul.f32 %v3433_v31, %v3425_v7  ;;  %v1253_v31 = vld [vmem:[%s4047_s14 + $0x28] sm:$0xff] }
 0x2ff   :  { %3116 = vmatmul.mubr.msk.f32.vlgmr.msra.gmra.mrb[4].mxu0 %vm668_vm4, %v706_v32  ;;  %v3347_v32 = vpack.c.bf16 %v1253_v31, %v1252_v30 }
 0x300   :  { %v3435_v33 = vpop.eup %3434  ;;  %3125 = vmatprep.mubr.msk.f32.mxu0 %vm3481_vm1, %v3480_v19 }
 0x301   :  { %v708_v34 = vmul.f32 %v3435_v33, %v3427_v9 }
 0x303   :  { %3121 = vmatmul.mubr.msk.f32.vlgmr.msra.gmra.mrb[10].mxu1 %vm668_vm4, %v708_v34 }
 0x304   :  { %3130 = vmatprep.mubr.msk.f32.mxu1 %vm3481_vm1, %v3480_v19 }
 0x365   :  { %v701_v35 = vpop.xlane.xlu1 %700 }
 0x366   :  { %3436 = vrcp.f32 %v701_v35 }
 0x369   :  { %v704_v36 = vpop.xlane.xlu0 %703  ;;  %v358_v37 = vpop.permute.xlu1 %357 }
 0x36a   :  { %3438 = vrcp.f32 %v704_v36  ;;  %3124 = vmatpush3.msra.mxu0 %v358_v37 }
 0x36b   :  { %3324 = vmatprep.subr.bf16.mxu0 %v3323_v46 }
 0x36d   :  { %v360_v38 = vpop.permute.xlu0 %359 }
 0x36e   :  { %3129 = vmatpush3.msra.mxu1 %v360_v38 }
 0x370   :  { %v3437_v39 = vpop.eup %3436 }
 0x371   :  { %v710_v40 = vmul.f32 %v3437_v39, %v3429_v25  ;;  %v1249_v25 = vld [vmem:[%s4047_s14 + $0x8] sm:$0xff] }
 0x373   :  { %3126 = vmatmul.mubr.msk.f32.vlgmr.msra.gmra.mrb[6].mxu0 %vm668_vm4, %v710_v40  ;;  %v2857_v40 = vld [vmem:[%s4048_s10] ss:$0 sm:$0xff] }
 0x374   :  { %v3439_v41 = vpop.eup %3438  ;;  %3326 = vmatpush3.bf16.msra.mxu0 %v3323_v46 }
 0x375   :  { %v712_v42 = vmul.f32 %v3439_v41, %v3431_v27  ;;  %3328 = vmatprep.subr.bf16.mxu0 %v3327_v53  ;;  %v3339_v27 = vpack.c.bf16 %v1249_v25, %v1248_v24  ;;  %v2885_v24 = vld [vmem:[%s4042_s6 + $0x30] sm:$0xff] }
 0x377   :  { %3131 = vmatmul.mubr.msk.f32.vlgmr.msra.gmra.mrb[12].mxu1 %vm668_vm4, %v712_v42  ;;  %v2858_v42 = vld [vmem:[%s4049_s11] ss:$0 sm:$0xff] }
 0x378   :  { %3330 = vmatpush3.bf16.msra.mxu0 %v3327_v53  ;;  %v2859_v53 = vld [vmem:[%s4050_s13] ss:$0 sm:$0xff] }
 0x379   :  { %3340 = vmatprep.subr.bf16.mxu0 %v3339_v27 }
 0x3d2   :  { %v782_v47 = vpop.f32.mrb[4].mxu0 }
 0x3d3   :  { %v3117_v48 = vpop.f32.mrb[5].mxu0 }
 0x3d6   :  { %v855_v49 = vpop.f32.mrb[10].mxu1 }
 0x3d7   :  { %v3122_v50 = vpop.f32.mrb[11].mxu1 }
 0x3d8   :  { %v1254_v50 = vld [vmem:[%s4047_s14 + $0x30] sm:$0xff] }
 0x3d9   :  { %v3351_v52 = vpack.c.bf16 %v1255_v51, %v1254_v50  ;;  %v2872_v51 = vld [vmem:[%s4041_s3 + $0x1] ss:$0 sm:$0xff] }
 0x446   :  { %v928_v54 = vpop.f32.mrb[6].mxu0 }
 0x447   :  { %1007 = vrot.lane.b32.xlu1 %v928_v54, %s3484_s4  ;;  %v3127_v55 = vpop.f32.mrb[7].mxu0 }
 0x44a   :  { %v1001_v56 = vpop.f32.mrb[12].mxu1 }
 0x44b   :  { %1009 = vrot.lane.b32.xlu1 %v1001_v56, %s3484_s4  ;;  %v3132_v57 = vpop.f32.mrb[13].mxu1 }
 0x4b9   :  { %v1008_v58 = vpop.permute.xlu1 %1007 }
 0x4ba   :  { %v1013_v59 = vsel %vm363_vm2, %v782_v47, %v1008_v58 }
 0x4bb   :  { %3141 = vmatprep.mubr.msk.f32.mxu0 %vm89_vm0, %v1013_v59 }
 0x4bd   :  { %v1010_v60 = vpop.permute.xlu1 %1009 }
 0x4be   :  { %v1014_v61 = vsel %vm363_vm2, %v855_v49, %v1010_v60  ;;  %v2862_v60 = vld [vmem:[%s4051_s15] ss:$0 sm:$0xff] }
 0x4bf   :  { %3142 = vmatmul.mubr.msk.f32.vlgmr.msra.gmra.mrb[8].mxu0 %vm89_vm0, %v1014_v61 }
 0x4c0   :  { %3342 = vmatpush3.bf16.msra.mxu0 %v3339_v27  ;;  %v3375_v27 = vpack.c.bf16 %v2886_v26, %v2885_v24 }
 0x4c1   :  { %3344 = vmatprep.subr.bf16.mxu0 %v3343_v29 }
 0x4c4   :  { %3346 = vmatpush3.bf16.msra.mxu0 %v3343_v29  ;;  %v2876_v29 = vld [vmem:[%s4066_s23 + $0x28] sm:$0xff] }
 0x4c5   :  { %3348 = vmatprep.subr.bf16.mxu0 %v3347_v32  ;;  %v3363_v30 = vpack.c.bf16 %v2876_v29, %v2875_v28 }
 0x4c8   :  { %3350 = vmatpush3.bf16.msra.mxu0 %v3347_v32 }
 0x4c9   :  { %3352 = vmatprep.subr.bf16.mxu0 %v3351_v52 }
 0x4cc   :  { %3354 = vmatpush3.bf16.msra.mxu0 %v3351_v52 }
 0x592   :  { %v3143_v63 = vpop.f32.mrb[8].mxu0 }
 0x593   :  { %v1104_v0 = vadd.f32 %v3143_v63, %v2854_v62  ;;  %v1098_v1 = vpop.f32.mrb[9].mxu0 }
 0x594   :  { %v1099_v2 = vadd.f32 %v2854_v62, %v1098_v1 }
 0x595   :  { %v1108_v3 = vadd.f32 %v1104_v0, %v3627_v18 }
 0x596   :  { %v1107_v4 = vadd.f32 %v1099_v2, %v3623_v17  ;;  %v1154_v17 = vld [vmem:[%s4046_s12] sm:$0xff] }
 0x597   :  { %v1114_v5 = vsel %vm89_vm0, %v1108_v3, 0.0  ;;  %v3331_v20 = vpack.c.bf16 %v1155_v16, %v1154_v17  ;;  %v2883_v16 = vld [vmem:[%s4042_s6 + $0x20] sm:$0xff] }
 0x598   :  { %1115 = vadd.xlane.f32.xlu1 %v1114_v5  ;;  %v1111_v6 = vsel %vm89_vm0, %v1107_v4, 0.0 }
 0x599   :  { %1112 = vadd.xlane.f32.xlu0 %v1111_v6  ;;  %3332 = vmatprep.subr.bf16.mxu1 %v3331_v20 }
 0x59a   :  { %3334 = vmatpush3.bf16.msra.mxu1 %v3331_v20  ;;  %v2884_v20 = vld [vmem:[%s4042_s6 + $0x28] sm:$0xff] }
 0x59b   :  { %3336 = vmatprep.subr.bf16.mxu1 %v3335_v23  ;;  %v3371_v21 = vpack.c.bf16 %v2884_v20, %v2883_v16 }
 0x59d   :  { %3372 = vmatprep.subr.bf16.mxu0 %v3371_v21 }
 0x59e   :  { %3338 = vmatpush3.bf16.msra.mxu1 %v3335_v23  ;;  %v2870_v23 = vld [vmem:[%s4067_s26 + $0x38] sm:$0xff] }
 0x59f   :  { %v3359_v25 = vpack.c.bf16 %v2870_v23, %v2869_v22 }
 0x625   :  { %v1116_v7 = vpop.xlane.xlu1 %1115 }
 0x626   :  { %v1119_v8 = vmul.f32 0.03125, %v1116_v7  ;;  %v1113_v9 = vpop.xlane.xlu0 %1112 }
 0x627   :  { %v1118_v10 = vmul.f32 0.03125, %v1113_v9 }
 0x628   :  { %v1121_v11 = vsub.f32 %v1108_v3, %v1119_v8 }
 0x629   :  { %v1120_v12 = vsub.f32 %v1107_v4, %v1118_v10 }
 0x62a   :  { %v1123_v15 = vmul.f32 %v1121_v11, %v1121_v11 }
 0x62b   :  { %v1122_v13 = vmul.f32 %v1120_v12, %v1120_v12 }
 0x62c   :  { %v1127_v18 = vsel %vm89_vm0, %v1123_v15, 0.0  ;;  %v2867_v15 = vld [vmem:[%s4067_s26 + $0x20] sm:$0xff] }
 0x62d   :  { %v1124_v14 = vsel %vm89_vm0, %v1122_v13, 0.0 }
 0x62e   :  { %1125 = vadd.xlane.f32.xlu0 %v1124_v14 }
 0x632   :  { %1128 = vadd.xlane.f32.xlu0 %v1127_v18  ;;  %v2868_v18 = vld [vmem:[%s4067_s26 + $0x28] sm:$0xff] }
 0x633   :  { %v3355_v17 = vpack.c.bf16 %v2868_v18, %v2867_v15 }
 0x635   :  { %3356 = vmatprep.subr.bf16.mxu1 %v3355_v17 }
 0x6bb   :  { %v1126_v33 = vpop.xlane.xlu0 %1125 }
 0x6bc   :  { %v1130_v34 = vmul.f32 0.03125, %v1126_v33 }
 0x6be   :  { %v1132_v35 = vadd.f32 1e-05, %v1130_v34 }
 0x6bf   :  { %v1129_v36 = vpop.xlane.xlu0 %1128 }
 0x6c0   :  { %3440 = vrsqrt.f32 %v1132_v35  ;;  %v1131_v37 = vmul.f32 0.03125, %v1129_v36 }
 0x6c2   :  { %v1133_v38 = vadd.f32 1e-05, %v1131_v37 }
 0x6c4   :  { %3442 = vrsqrt.f32 %v1133_v38  ;;  %v2865_v38 = vld [vmem:[%s4052_s16] ss:$0 sm:$0xff] }
 0x6ca   :  { %v3441_v39 = vpop.eup %3440 }
 0x6cb   :  { %v1136_v41 = vmul.f32 %v3441_v39, %v1120_v12 }
 0x6cd   :  { %v1144_v43 = vmul.f32 %v2857_v40, %v1136_v41 }
 0x6ce   :  { %v3443_v44 = vpop.eup %3442 }
 0x6cf   :  { %v1137_v46 = vmul.f32 %v3443_v44, %v1121_v11  ;;  %v1152_v47 = vadd.f32 %v2858_v42, %v1144_v43 }
 0x6d1   :  { %v1145_v48 = vmul.f32 %v2857_v40, %v1137_v46  ;;  %3152 = vmatprep.mubr.msk.f32.mxu1 %vm89_vm0, %v1152_v47  ;;  %v2877_v46 = vld [vmem:[%s4066_s23 + $0x30] sm:$0xff] }
 0x6d3   :  { %v1153_v49 = vadd.f32 %v2858_v42, %v1145_v48  ;;  %v2866_v42 = vld [vmem:[%s4053_s17] ss:$0 sm:$0xff] }
 0x6d5   :  { %3153 = vmatmul.mubr.msk.f32.vlgmr.msra.gmra.mrb[14].mxu1 %vm89_vm0, %v1153_v49 }
 0x6d6   :  { %3358 = vmatpush3.bf16.msra.mxu1 %v3355_v17 }
 0x6d7   :  { %3360 = vmatprep.subr.bf16.mxu1 %v3359_v25 }
 0x6da   :  { %3362 = vmatpush3.bf16.msra.mxu1 %v3359_v25 }
 0x6db   :  { %3364 = vmatprep.subr.bf16.mxu1 %v3363_v30 }
 0x7a8   :  { %v3154_v54 = vpop.f32.mrb[14].mxu1 }
 0x7a9   :  { %v1243_v55 = vadd.f32 %v3154_v54, %v2859_v53  ;;  %v1237_v56 = vpop.f32.mrb[15].mxu1 }
 0x7aa   :  { %v1238_v57 = vadd.f32 %v2859_v53, %v1237_v56 }
 0x7ab   :  { %v1247_v59 = vmax.f32 %v1243_v55, 0.0 }
 0x7ac   :  { %v1246_v58 = vmax.f32 %v1238_v57, 0.0  ;;  %v2880_v57 = vld [vmem:[%s4070_s2 + $0x1] ss:$0 sm:$0xff] }
 0x7ae   :  { %3171 = vmatprep.mubr.msk.f32.mxu0 %vm1263_vm5, %v1246_v58 }
 0x7af   :  { %3172 = vmatmul.mubr.msk.f32.vlgmr.msra.gmra.mrb[10].mxu0 %vm1263_vm5, %v1247_v59 }
 0x7b0   :  { %3374 = vmatpush3.bf16.msra.mxu0 %v3371_v21 }
 0x7b1   :  { %3376 = vmatprep.subr.bf16.mxu0 %v3375_v27 }
 0x7b4   :  { %3378 = vmatpush3.bf16.msra.mxu0 %v3375_v27 }
 0x7b5   :  { %3217 = vmatprep.subr.mxu0 %v3480_v19 }
 0x882   :  { %v3173_v61 = vpop.f32.mrb[10].mxu0 }
 0x883   :  { %v1342_v62 = vadd.f32 %v3173_v61, %v2862_v60  ;;  %v1336_v63 = vpop.f32.mrb[11].mxu0 }
 0x884   :  { %v1337_v0 = vadd.f32 %v2862_v60, %v1336_v63 }
 0x885   :  { %v1346_v1 = vadd.f32 %v1342_v62, %v1153_v49 }
 0x886   :  { %v1345_v2 = vadd.f32 %v1337_v0, %v1152_v47  ;;  %v2878_v47 = vld [vmem:[%s4066_s23 + $0x38] sm:$0xff] }
 0x887   :  { %v1352_v3 = vsel %vm89_vm0, %v1346_v1, 0.0  ;;  %v3367_v50 = vpack.c.bf16 %v2878_v47, %v2877_v46 }
 0x888   :  { %1353 = vadd.xlane.f32.xlu0 %v1352_v3  ;;  %v1349_v4 = vsel %vm89_vm0, %v1345_v2, 0.0 }
 0x889   :  { %1350 = vadd.xlane.f32.xlu1 %v1349_v4 }
 0x915   :  { %v1354_v5 = vpop.xlane.xlu0 %1353 }
 0x916   :  { %v1356_v6 = vmul.f32 0.03125, %v1354_v5  ;;  %v1351_v7 = vpop.xlane.xlu1 %1350 }
 0x917   :  { %v1355_v8 = vmul.f32 0.03125, %v1351_v7 }
 0x918   :  { %v1358_v9 = vsub.f32 %v1346_v1, %v1356_v6  ;;  %v2888_v1 = vld [vmem:[%s4043_s7 + $0x1] ss:$0 sm:$0xff] }
 0x919   :  { %v1357_v10 = vsub.f32 %v1345_v2, %v1355_v8 }
 0x91a   :  { %v1360_v11 = vmul.f32 %v1358_v9, %v1358_v9 }
 0x91b   :  { %v1359_v12 = vmul.f32 %v1357_v10, %v1357_v10 }
 0x91c   :  { %v1364_v13 = vsel %vm89_vm0, %v1360_v11, 0.0 }
 0x91d   :  { %1365 = vadd.xlane.f32.xlu0 %v1364_v13  ;;  %v1361_v14 = vsel %vm89_vm0, %v1359_v12, 0.0 }
 0x91e   :  { %1362 = vadd.xlane.f32.xlu1 %v1361_v14 }
 0x9aa   :  { %v1366_v31 = vpop.xlane.xlu0 %1365 }
 0x9ab   :  { %v1368_v32 = vmul.f32 0.03125, %v1366_v31  ;;  %v1363_v33 = vpop.xlane.xlu1 %1362 }
 0x9ac   :  { %v1367_v34 = vmul.f32 0.03125, %v1363_v33 }
 0x9ad   :  { %v1370_v35 = vadd.f32 1e-05, %v1368_v32 }
 0x9ae   :  { %v1369_v36 = vadd.f32 1e-05, %v1367_v34 }
 0x9af   :  { %3444 = vrsqrt.f32 %v1370_v35 }
 0x9b0   :  { %3446 = vrsqrt.f32 %v1369_v36 }
 0x9b9   :  { %v3445_v37 = vpop.eup %3444 }
 0x9ba   :  { %v3447_v39 = vpop.eup %3446  ;;  %v1374_v40 = vmul.f32 %v3445_v37, %v1358_v9 }
 0x9bb   :  { %v1373_v41 = vmul.f32 %v3447_v39, %v1357_v10 }
 0x9bc   :  { %v1382_v43 = vmul.f32 %v2865_v38, %v1374_v40 }
 0x9bd   :  { %v1381_v44 = vmul.f32 %v2865_v38, %v1373_v41 }
 0x9be   :  { %v3844_v49 = vadd.f32 %v2866_v42, %v1382_v43 }
 0x9bf   :  { %v3842_v48 = vadd.f32 %v2866_v42, %v1381_v44 }
 0x9c1   :  { %3182 = vmatprep.mubr.msk.f32.mxu1 %vm89_vm0, %v3842_v48  ;;  %3204 = vmatprep.mubr.msk.f32.mxu0 %vm89_vm0, %v3842_v48 }
 0x9c2   :  { %3183 = vmatmul.mubr.msk.f32.vlgmr.msra.gmra.mrb[16].mxu1 %vm89_vm0, %v3844_v49  ;;  %3205 = vmatmul.mubr.msk.f32.vlgmr.msra.gmra.mrb[12].mxu0 %vm89_vm0, %v3844_v49 }
 0x9c3   :  { %3366 = vmatpush3.bf16.msra.mxu1 %v3363_v30  ;;  %3193 = vmatprep.mubr.msk.f32.mxu1 %vm89_vm0, %v3842_v48 }
 0x9c4   :  { %3368 = vmatprep.subr.bf16.mxu1 %v3367_v50  ;;  %3219 = vmatprep.mubr.msk.f32.mxu0 %vm3481_vm1, %v3480_v19 }
 0x9c7   :  { %3370 = vmatpush3.bf16.msra.mxu1 %v3367_v50 }
 0x9c8   :  { %3207 = vmatprep.subr.mxu1 %v3480_v19 }
 0x9ca   :  { %3194 = vmatmul.mubr.msk.f32.vlgmr.msra.gmra.mrb[18].mxu1 %vm89_vm0, %v3844_v49 }
 0x9cb   :  { %3209 = vmatprep.mubr.msk.f32.mxu1 %vm3481_vm1, %v3480_v19 }
 0xa95   :  { %v3184_v52 = vpop.f32.mrb[16].mxu1  ;;  %v3206_v53 = vpop.f32.mrb[12].mxu0 }
 0xa96   :  { %v1476_v54 = vpop.f32.mrb[17].mxu1  ;;  %v1652_v55 = vpop.f32.mrb[13].mxu0  ;;  %v1482_v62 = vadd.f32 %v3184_v52, %v2872_v51  ;;  %v3890_v4 = vadd.f32 %v3206_v53, %v2888_v1 }
 0xa97   :  { %v1477_v56 = vadd.f32 %v2872_v51, %v1476_v54  ;;  %v1653_v3 = vadd.f32 %v2888_v1, %v1652_v55 }
 0xa99   :  { %1663 = vrot.lane.b32.xlu1 %v1477_v56, %s3482_s0 }
 0xa9d   :  { %v3195_v58 = vpop.f32.mrb[18].mxu1 }
 0xa9e   :  { %v1570_v59 = vadd.f32 %v3195_v58, %v2880_v57  ;;  %v1564_v60 = vpop.f32.mrb[19].mxu1 }
 0xa9f   :  { %v1565_v61 = vadd.f32 %v2880_v57, %v1564_v60 }
 0xaa0   :  { %1671 = vrot.lane.b32.xlu0 %v1570_v59, %s3482_s0 }
 0xaa1   :  { %3208 = vmatpush3.xpose.msk.msra.mxu1 %vm363_vm2, %v1565_v61  ;;  %1669 = vrot.lane.b32.xlu1 %v1565_v61, %s3482_s0 }
 0xaa2   :  { %3212 = vmatprep.subr.mxu1 %v3480_v19 }
 0xaa4   :  { %3210 = vmatmul.mubr.msk.f32.vlgmr.msra.gmra.mrb[20].mxu1 %vm363_vm2, %v1477_v56 }
 0xaa5   :  { %1665 = vrot.lane.b32.xlu1 %v1482_v62, %s3482_s0  ;;  %3213 = vmatpush3.xpose.msk.msra.mxu1 %vm363_vm2, %v1570_v59 }
 0xaa6   :  { %3214 = vmatprep.mubr.msk.f32.mxu1 %vm3481_vm1, %v3480_v19  ;;  %3222 = vmatprep.subr.mxu1 %v3480_v19 }
 0xaa8   :  { %3215 = vmatmul.mubr.msk.f32.vlgmr.msra.gmra.mrb[22].mxu1 %vm363_vm2, %v1482_v62 }
 0xaa9   :  { %3224 = vmatprep.mubr.msk.f32.mxu1 %vm3481_vm1, %v3480_v19 }
 0xb0b   :  { %v1664_v63 = vpop.permute.xlu1 %1663 }
 0xb12   :  { %v1672_v0 = vpop.permute.xlu0 %1671 }
 0xb13   :  { %v1670_v2 = vpop.permute.xlu1 %1669  ;;  %3223 = vmatpush3.xpose.msk.msra.mxu1 %vm363_vm2, %v1672_v0 }
 0xb14   :  { %3218 = vmatpush3.xpose.msk.msra.mxu0 %vm363_vm2, %v1670_v2  ;;  %3232 = vmatprep.subr.mxu1 %v3480_v19 }
 0xb15   :  { %3227 = vmatprep.subr.mxu0 %v3480_v19 }
 0xb17   :  { %3220 = vmatmul.mubr.msk.f32.vlgmr.msra.gmra.mrb[14].mxu0 %vm363_vm2, %v1664_v63  ;;  %v1666_v5 = vpop.permute.xlu1 %1665  ;;  %v2904_v63 = vld [vmem:[%s4044_s8 + $0x28] sm:$0xff] }
 0xb18   :  { %3225 = vmatmul.mubr.msk.f32.vlgmr.msra.gmra.mrb[24].mxu1 %vm363_vm2, %v1666_v5  ;;  %3228 = vmatpush3.msra.mxu0 %v1653_v3  ;;  %v2905_v5 = vld [vmem:[%s4044_s8 + $0x30] sm:$0xff] }
 0xb19   :  { %3233 = vmatpush3.msra.mxu1 %v3890_v4  ;;  %3229 = vmatprep.mubr.msk.f32.mxu0 %vm3481_vm1, %v3480_v19 }
 0xb1a   :  { %3234 = vmatprep.mubr.msk.f32.mxu1 %vm3481_vm1, %v3480_v19  ;;  %3237 = vmatprep.subr.mxu0 %v3480_v19 }
 0xb1b   :  { %3242 = vmatprep.subr.mxu1 %v3480_v19 }
 0xb77   :  { %v1751_v6 = vpop.f32.mrb[20].mxu1 }
 0xb78   :  { %v1977_v7 = vmul.f32 0.25, %v1751_v6  ;;  %v3211_v8 = vpop.f32.mrb[21].mxu1  ;;  %v2906_v6 = vld [vmem:[%s4044_s8 + $0x38] sm:$0xff] }
 0xb7a   :  { %v1981_v9 = vadd.f32 %v1977_v7, %v3687_v45  ;;  %v3383_v7 = vpack.c.bf16 %v2906_v6, %v2905_v5  ;;  %v2920_v5 = vld [vmem:[%s4050_s13 + $0x1] ss:$0 sm:$0xff] }
 0xb7b   :  { %v1825_v10 = vpop.f32.mrb[22].mxu1 }
 0xb7c   :  { %v1978_v11 = vmul.f32 0.25, %v1825_v10  ;;  %v3216_v12 = vpop.f32.mrb[23].mxu1  ;;  %v1985_v13 = vsel %vm668_vm4, %v1981_v9, -inf }
 0xb7d   :  { %1986 = vmax.xlane.f32.xlu0 %v1985_v13 }
 0xb7e   :  { %v1982_v14 = vadd.f32 %v1978_v11, %v3687_v45 }
 0xb80   :  { %v1988_v15 = vsel %vm668_vm4, %v1982_v14, -inf }
 0xb81   :  { %1989 = vmax.xlane.f32.xlu1 %v1988_v15 }
 0xbea   :  { %v1899_v18 = vpop.f32.mrb[14].mxu0 }
 0xbeb   :  { %v1979_v17 = vmul.f32 0.25, %v1899_v18  ;;  %v3221_v16 = vpop.f32.mrb[15].mxu0  ;;  %v1973_v20 = vpop.f32.mrb[24].mxu1  ;;  %v2908_v18 = vld [vmem:[%s4045_s9 + $0x1] ss:$0 sm:$0xff] }
 0xbec   :  { %v1980_v21 = vmul.f32 0.25, %v1973_v20  ;;  %v3226_v22 = vpop.f32.mrb[25].mxu1 }
 0xbed   :  { %v1983_v23 = vadd.f32 %v1979_v17, %v3687_v45 }
 0xbee   :  { %v1984_v25 = vadd.f32 %v1980_v21, %v3687_v45 }
 0xbef   :  { %v1991_v24 = vsel %vm668_vm4, %v1983_v23, -inf }
 0xbf0   :  { %1992 = vmax.xlane.f32.xlu0 %v1991_v24  ;;  %v1994_v26 = vsel %vm668_vm4, %v1984_v25, -inf }
 0xbf4   :  { %1995 = vmax.xlane.f32.xlu0 %v1994_v26 }
 0xc0a   :  { %v1987_v27 = vpop.xlane.xlu0 %1986 }
 0xc0b   :  { %v1997_v28 = vsub.f32 %v1981_v9, %v1987_v27 }
 0xc0d   :  { %v2001_v29 = vmul.f32 1.442695, %v1997_v28 }
 0xc0e   :  { %v1990_v30 = vpop.xlane.xlu1 %1989 }
 0xc0f   :  { %3448 = vpow2.f32 %v2001_v29  ;;  %v1998_v31 = vsub.f32 %v1982_v14, %v1990_v30 }
 0xc11   :  { %v2003_v32 = vmul.f32 1.442695, %v1998_v31 }
 0xc13   :  { %3450 = vpow2.f32 %v2003_v32 }
 0xc19   :  { %v3449_v33 = vpop.eup %3448 }
 0xc1a   :  { %v2009_v34 = vsel %vm668_vm4, %v3449_v33, 0.0 }
 0xc1b   :  { %2010 = vadd.xlane.f32.xlu1 %v2009_v34 }
 0xc1d   :  { %v3451_v35 = vpop.eup %3450 }
 0xc1e   :  { %v2012_v36 = vsel %vm668_vm4, %v3451_v35, 0.0 }
 0xc1f   :  { %2013 = vadd.xlane.f32.xlu0 %v2012_v36 }
 0xc7d   :  { %v1993_v45 = vpop.xlane.xlu0 %1992 }
 0xc7e   :  { %v1999_v37 = vsub.f32 %v1983_v23, %v1993_v45  ;;  %v2917_v45 = vld [vmem:[%s4046_s12 + $0x30] sm:$0xff] }
 0xc80   :  { %v2005_v38 = vmul.f32 1.442695, %v1999_v37  ;;  %v2918_v37 = vld [vmem:[%s4046_s12 + $0x38] sm:$0xff] }
 0xc81   :  { %v1996_v39 = vpop.xlane.xlu0 %1995 }
 0xc82   :  { %3452 = vpow2.f32 %v2005_v38  ;;  %v2000_v40 = vsub.f32 %v1984_v25, %v1996_v39  ;;  %v3391_v38 = vpack.c.bf16 %v2918_v37, %v2917_v45  ;;  %v2923_v39 = vld [vmem:[%s4047_s14 + $0x40] sm:$0xff] }
 0xc84   :  { %v2007_v41 = vmul.f32 1.442695, %v2000_v40  ;;  %v2924_v40 = vld [vmem:[%s4047_s14 + $0x48] sm:$0xff] }
 0xc86   :  { %3454 = vpow2.f32 %v2007_v41  ;;  %v2925_v41 = vld [vmem:[%s4047_s14 + $0x50] sm:$0xff] }
 0xc8c   :  { %v3453_v42 = vpop.eup %3452 }
 0xc8d   :  { %v2015_v43 = vsel %vm668_vm4, %v3453_v42, 0.0 }
 0xc8e   :  { %2016 = vadd.xlane.f32.xlu1 %v2015_v43  ;;  %v2926_v43 = vld [vmem:[%s4047_s14 + $0x58] sm:$0xff] }
 0xc90   :  { %v3455_v44 = vpop.eup %3454 }
 0xc91   :  { %v2018_v46 = vsel %vm668_vm4, %v3455_v44, 0.0 }
 0xc92   :  { %2019 = vadd.xlane.f32.xlu0 %v2018_v46  ;;  %v2927_v46 = vld [vmem:[%s4047_s14 + $0x60] sm:$0xff] }
 0xc9f   :  { %1675 = vrot.lane.b32.xlu1 %v1653_v3, %s3482_s0 }
 0xca8   :  { %v2011_v47 = vpop.xlane.xlu1 %2010  ;;  %1677 = vrot.lane.b32.xlu0 %v3890_v4, %s3482_s0 }
 0xca9   :  { %3456 = vrcp.f32 %v2011_v47  ;;  %v2928_v47 = vld [vmem:[%s4047_s14 + $0x68] sm:$0xff] }
 0xcac   :  { %v2014_v50 = vpop.xlane.xlu0 %2013 }
 0xcad   :  { %3458 = vrcp.f32 %v2014_v50  ;;  %v3403_v50 = vpack.c.bf16 %v2928_v47, %v2927_v46  ;;  %v2938_v47 = vld [vmem:[%s4053_s17 + $0x1] ss:$0 sm:$0xff] }
 0xcb3   :  { %v3457_v51 = vpop.eup %3456 }
 0xcb4   :  { %v2022_v52 = vmul.f32 %v3457_v51, %v3449_v33 }
 0xcb6   :  { %3230 = vmatmul.mubr.msk.f32.vlgmr.msra.gmra.mrb[16].mxu0 %vm668_vm4, %v2022_v52 }
 0xcb7   :  { %v3459_v53 = vpop.eup %3458  ;;  %3239 = vmatprep.mubr.msk.f32.mxu0 %vm3481_vm1, %v3480_v19 }
 0xcb8   :  { %v2024_v54 = vmul.f32 %v3459_v53, %v3451_v35  ;;  %v2916_v35 = vld [vmem:[%s4046_s12 + $0x28] sm:$0xff] }
 0xcba   :  { %3235 = vmatmul.mubr.msk.f32.vlgmr.msra.gmra.mrb[26].mxu1 %vm668_vm4, %v2024_v54 }
 0xcbb   :  { %3244 = vmatprep.mubr.msk.f32.mxu1 %vm3481_vm1, %v3480_v19  ;;  %v2903_v19 = vld [vmem:[%s4044_s8 + $0x20] sm:$0xff] }
 0xcbc   :  { %v3379_v0 = vpack.c.bf16 %v2904_v63, %v2903_v19 }
 0xd1b   :  { %v2017_v55 = vpop.xlane.xlu1 %2016 }
 0xd1c   :  { %3460 = vrcp.f32 %v2017_v55 }
 0xd1f   :  { %v1676_v56 = vpop.permute.xlu1 %1675  ;;  %v2020_v57 = vpop.xlane.xlu0 %2019 }
 0xd20   :  { %3462 = vrcp.f32 %v2020_v57  ;;  %3238 = vmatpush3.msra.mxu0 %v1676_v56 }
 0xd21   :  { %3380 = vmatprep.subr.bf16.mxu0 %v3379_v0 }
 0xd23   :  { %v1678_v58 = vpop.permute.xlu0 %1677 }
 0xd24   :  { %3243 = vmatpush3.msra.mxu1 %v1678_v58  ;;  %v2913_v58 = vld [vmem:[%s4048_s10 + $0x1] ss:$0 sm:$0xff] }
 0xd26   :  { %v3461_v59 = vpop.eup %3460 }
 0xd27   :  { %v2026_v60 = vmul.f32 %v3461_v59, %v3453_v42  ;;  %v3395_v42 = vpack.c.bf16 %v2924_v40, %v2923_v39 }
 0xd29   :  { %3240 = vmatmul.mubr.msk.f32.vlgmr.msra.gmra.mrb[18].mxu0 %vm668_vm4, %v2026_v60  ;;  %v2914_v60 = vld [vmem:[%s4049_s11 + $0x1] ss:$0 sm:$0xff] }
 0xd2a   :  { %v3463_v61 = vpop.eup %3462  ;;  %3382 = vmatpush3.bf16.msra.mxu0 %v3379_v0 }
 0xd2b   :  { %v2028_v62 = vmul.f32 %v3463_v61, %v3455_v44  ;;  %3384 = vmatprep.subr.bf16.mxu0 %v3383_v7  ;;  %v3399_v44 = vpack.c.bf16 %v2926_v43, %v2925_v41 }
 0xd2d   :  { %3245 = vmatmul.mubr.msk.f32.vlgmr.msra.gmra.mrb[28].mxu1 %vm668_vm4, %v2028_v62 }
 0xd2e   :  { %3386 = vmatpush3.bf16.msra.mxu0 %v3383_v7 }
 0xd2f   :  { %3396 = vmatprep.subr.bf16.mxu0 %v3395_v42 }
 0xd89   :  { %v2098_v1 = vpop.f32.mrb[16].mxu0 }
 0xd8a   :  { %v3231_v2 = vpop.f32.mrb[17].mxu0 }
 0xd8b   :  { %v2929_v2 = vld [vmem:[%s4047_s14 + $0x70] sm:$0xff] }
 0xd8d   :  { %v2171_v3 = vpop.f32.mrb[26].mxu1 }
 0xd8e   :  { %v3236_v4 = vpop.f32.mrb[27].mxu1 }
 0xdfc   :  { %v2244_v8 = vpop.f32.mrb[18].mxu0 }
 0xdfd   :  { %2323 = vrot.lane.b32.xlu1 %v2244_v8, %s3484_s4  ;;  %v3241_v9 = vpop.f32.mrb[19].mxu0 }
 0xe00   :  { %v2317_v10 = vpop.f32.mrb[28].mxu1 }
 0xe01   :  { %2325 = vrot.lane.b32.xlu1 %v2317_v10, %s3484_s4  ;;  %v3246_v11 = vpop.f32.mrb[29].mxu1 }
 0xe6f   :  { %v2324_v12 = vpop.permute.xlu1 %2323 }
 0xe70   :  { %v2329_v13 = vsel %vm363_vm2, %v2098_v1, %v2324_v12  ;;  %v2932_v12 = vld [vmem:[%s4051_s15 + $0x1] ss:$0 sm:$0xff] }
 0xe71   :  { %3255 = vmatprep.mubr.msk.f32.mxu0 %vm89_vm0, %v2329_v13 }
 0xe73   :  { %v2326_v14 = vpop.permute.xlu1 %2325 }
 0xe74   :  { %v2330_v15 = vsel %vm363_vm2, %v2171_v3, %v2326_v14  ;;  %v2930_v3 = vld [vmem:[%s4047_s14 + $0x78] sm:$0xff] }
 0xe75   :  { %3256 = vmatmul.mubr.msk.f32.vlgmr.msra.gmra.mrb[20].mxu0 %vm89_vm0, %v2330_v15  ;;  %v3407_v4 = vpack.c.bf16 %v2930_v3, %v2929_v2 }
 0xe76   :  { %3398 = vmatpush3.bf16.msra.mxu0 %v3395_v42  ;;  %v2937_v42 = vld [vmem:[%s4052_s16 + $0x1] ss:$0 sm:$0xff] }
 0xe77   :  { %3400 = vmatprep.subr.bf16.mxu0 %v3399_v44 }
 0xe7a   :  { %3402 = vmatpush3.bf16.msra.mxu0 %v3399_v44 }
 0xe7b   :  { %3404 = vmatprep.subr.bf16.mxu0 %v3403_v50 }
 0xe7e   :  { %3406 = vmatpush3.bf16.msra.mxu0 %v3403_v50 }
 0xe7f   :  { %3408 = vmatprep.subr.bf16.mxu0 %v3407_v4 }
 0xe82   :  { %3410 = vmatpush3.bf16.msra.mxu0 %v3407_v4 }
 0xf48   :  { %v3257_v17 = vpop.f32.mrb[20].mxu0 }
 0xf49   :  { %v2422_v16 = vadd.f32 %v3257_v17, %v2908_v18  ;;  %v2416_v20 = vpop.f32.mrb[21].mxu0 }
 0xf4a   :  { %v2417_v21 = vadd.f32 %v2908_v18, %v2416_v20 }
 0xf4b   :  { %v2426_v22 = vadd.f32 %v2422_v16, %v3844_v49 }
 0xf4c   :  { %v2425_v23 = vadd.f32 %v2417_v21, %v3842_v48  ;;  %v2915_v48 = vld [vmem:[%s4046_s12 + $0x20] sm:$0xff] }
 0xf4d   :  { %v2434_v24 = vsel %vm89_vm0, %v2426_v22, 0.0  ;;  %v3387_v36 = vpack.c.bf16 %v2916_v35, %v2915_v48  ;;  %v2718_v48 = vld [vmem:[%s4054_s18 + $0x18] sm:$0xff] }
 0xf4e   :  { %2435 = vadd.xlane.f32.xlu1 %v2434_v24  ;;  %v2431_v25 = vsel %vm89_vm0, %v2425_v23, 0.0 }
 0xf4f   :  { %2432 = vadd.xlane.f32.xlu0 %v2431_v25  ;;  %3388 = vmatprep.subr.bf16.mxu1 %v3387_v36 }
 0xf50   :  { %3390 = vmatpush3.bf16.msra.mxu1 %v3387_v36 }
 0xf51   :  { %3392 = vmatprep.subr.bf16.mxu1 %v3391_v38 }
 0xf54   :  { %3394 = vmatpush3.bf16.msra.mxu1 %v3391_v38 }
 0xfdb   :  { %v2436_v26 = vpop.xlane.xlu1 %2435 }
 0xfdc   :  { %v2438_v27 = vmul.f32 0.03125, %v2436_v26  ;;  %v2433_v28 = vpop.xlane.xlu0 %2432 }
 0xfdd   :  { %v2437_v29 = vmul.f32 0.03125, %v2433_v28 }
 0xfde   :  { %v2440_v30 = vsub.f32 %v2426_v22, %v2438_v27 }
 0xfdf   :  { %v2439_v31 = vsub.f32 %v2425_v23, %v2437_v29 }
 0xfe0   :  { %v2442_v34 = vmul.f32 %v2440_v30, %v2440_v30 }
 0xfe1   :  { %v2441_v32 = vmul.f32 %v2439_v31, %v2439_v31 }
 0xfe2   :  { %v2446_v49 = vsel %vm89_vm0, %v2442_v34, 0.0 }
 0xfe3   :  { %v2443_v33 = vsel %vm89_vm0, %v2441_v32, 0.0  ;;  %v2715_v32 = vld [vmem:[%s4054_s18] sm:$0xff] }
 0xfe4   :  { %2444 = vadd.xlane.f32.xlu0 %v2443_v33  ;;  %v2716_v33 = vld [vmem:[%s4054_s18 + $0x8] sm:$0xff] }
 0xfe5   :  { %v3411_v34 = vpack.c.bf16 %v2716_v33, %v2715_v32 }
 0xfe7   :  { %3412 = vmatprep.subr.bf16.mxu1 %v3411_v34 }
 0xfe8   :  { %2447 = vadd.xlane.f32.xlu0 %v2446_v49  ;;  %v2717_v49 = vld [vmem:[%s4054_s18 + $0x10] sm:$0xff] }
 0xfe9   :  { %v3415_v35 = vpack.c.bf16 %v2718_v48, %v2717_v49 }
0x1071   :  { %v2445_v51 = vpop.xlane.xlu0 %2444 }
0x1072   :  { %v2449_v52 = vmul.f32 0.03125, %v2445_v51 }
0x1074   :  { %v2451_v53 = vadd.f32 1e-05, %v2449_v52 }
0x1075   :  { %v2448_v54 = vpop.xlane.xlu0 %2447 }
0x1076   :  { %3464 = vrsqrt.f32 %v2451_v53  ;;  %v2450_v55 = vmul.f32 0.03125, %v2448_v54  ;;  %v2939_v54 = vld [vmem:[%s4055_s19] ss:$0 sm:$0xff] }
0x1078   :  { %v2452_v56 = vadd.f32 1e-05, %v2450_v55 }
0x107a   :  { %3466 = vrsqrt.f32 %v2452_v56 }
0x1080   :  { %v3465_v57 = vpop.eup %3464 }
0x1081   :  { %v2455_v59 = vmul.f32 %v3465_v57, %v2439_v31 }
0x1083   :  { %v2463_v61 = vmul.f32 %v2913_v58, %v2455_v59 }
0x1084   :  { %v3467_v62 = vpop.eup %3466 }
0x1085   :  { %v2456_v19 = vmul.f32 %v3467_v62, %v2440_v30  ;;  %v2471_v63 = vadd.f32 %v2914_v60, %v2463_v61 }
0x1087   :  { %v2464_v0 = vmul.f32 %v2913_v58, %v2456_v19  ;;  %3266 = vmatprep.mubr.msk.f32.mxu1 %vm89_vm0, %v2471_v63 }
0x1089   :  { %v2472_v1 = vadd.f32 %v2914_v60, %v2464_v0 }
0x108b   :  { %3267 = vmatmul.mubr.msk.f32.vlgmr.msra.gmra.mrb[30].mxu1 %vm89_vm0, %v2472_v1 }
0x108c   :  { %3414 = vmatpush3.bf16.msra.mxu1 %v3411_v34 }
0x108d   :  { %3416 = vmatprep.subr.bf16.mxu1 %v3415_v35 }
0x1090   :  { %3418 = vmatpush3.bf16.msra.mxu1 %v3415_v35 }
0x115e   :  { %v3268_v6 = vpop.f32.mrb[30].mxu1 }
0x115f   :  { %v2564_v7 = vadd.f32 %v3268_v6, %v2920_v5  ;;  %v2558_v8 = vpop.f32.mrb[31].mxu1 }
0x1160   :  { %v2559_v9 = vadd.f32 %v2920_v5, %v2558_v8 }
0x1161   :  { %v2568_v11 = vmax.f32 %v2564_v7, 0.0 }
0x1162   :  { %v2567_v10 = vmax.f32 %v2559_v9, 0.0 }
0x1164   :  { %3285 = vmatprep.mubr.msk.f32.mxu0 %vm1263_vm5, %v2567_v10 }
0x1165   :  { %3286 = vmatmul.mubr.msk.f32.vlgmr.msra.gmra.mrb[22].mxu0 %vm1263_vm5, %v2568_v11 }
0x1238   :  { %v3287_v13 = vpop.f32.mrb[22].mxu0 }
0x1239   :  { %v2664_v14 = vadd.f32 %v3287_v13, %v2932_v12  ;;  %v2658_v15 = vpop.f32.mrb[23].mxu0 }
0x123a   :  { %v2659_v18 = vadd.f32 %v2932_v12, %v2658_v15 }
0x123b   :  { %v2668_v17 = vadd.f32 %v2664_v14, %v2472_v1 }
0x123c   :  { %v2667_v16 = vadd.f32 %v2659_v18, %v2471_v63 }
0x123d   :  { %v2676_v20 = vsel %vm89_vm0, %v2668_v17, 0.0 }
0x123e   :  { %2677 = vadd.xlane.f32.xlu0 %v2676_v20  ;;  %v2673_v21 = vsel %vm89_vm0, %v2667_v16, 0.0 }
0x123f   :  { %2674 = vadd.xlane.f32.xlu1 %v2673_v21 }
0x12cb   :  { %v2678_v22 = vpop.xlane.xlu0 %2677 }
0x12cc   :  { %v2680_v23 = vmul.f32 0.03125, %v2678_v22  ;;  %v2675_v24 = vpop.xlane.xlu1 %2674 }
0x12cd   :  { %v2679_v25 = vmul.f32 0.03125, %v2675_v24 }
0x12ce   :  { %v2682_v26 = vsub.f32 %v2668_v17, %v2680_v23 }
0x12cf   :  { %v2681_v27 = vsub.f32 %v2667_v16, %v2679_v25 }
0x12d0   :  { %v2684_v28 = vmul.f32 %v2682_v26, %v2682_v26 }
0x12d1   :  { %v2683_v29 = vmul.f32 %v2681_v27, %v2681_v27 }
0x12d2   :  { %v2688_v30 = vsel %vm89_vm0, %v2684_v28, 0.0 }
0x12d3   :  { %2689 = vadd.xlane.f32.xlu0 %v2688_v30  ;;  %v2685_v31 = vsel %vm89_vm0, %v2683_v29, 0.0 }
0x12d4   :  { %2686 = vadd.xlane.f32.xlu1 %v2685_v31 }
0x1360   :  { %v2690_v36 = vpop.xlane.xlu0 %2689 }
0x1361   :  { %v2692_v45 = vmul.f32 0.03125, %v2690_v36  ;;  %v2687_v37 = vpop.xlane.xlu1 %2686 }
0x1362   :  { %v2691_v38 = vmul.f32 0.03125, %v2687_v37 }
0x1363   :  { %v2694_v39 = vadd.f32 1e-05, %v2692_v45 }
0x1364   :  { %v2693_v40 = vadd.f32 1e-05, %v2691_v38 }
0x1365   :  { %3468 = vrsqrt.f32 %v2694_v39 }
0x1366   :  { %3470 = vrsqrt.f32 %v2693_v40 }
0x136f   :  { %v3469_v41 = vpop.eup %3468 }
0x1370   :  { %v3471_v43 = vpop.eup %3470  ;;  %v2698_v44 = vmul.f32 %v3469_v41, %v2682_v26 }
0x1371   :  { %v2697_v46 = vmul.f32 %v3471_v43, %v2681_v27 }
0x1372   :  { %v2706_v50 = vmul.f32 %v2937_v42, %v2698_v44 }
0x1373   :  { %v2705_v51 = vmul.f32 %v2937_v42, %v2697_v46 }
0x1374   :  { %v2714_v53 = vadd.f32 %v2938_v47, %v2706_v50 }
0x1375   :  { %v2713_v52 = vadd.f32 %v2938_v47, %v2705_v51 }
0x1377   :  { %3296 = vmatprep.mubr.msk.f32.mxu1 %vm89_vm0, %v2713_v52 }
0x1378   :  { %3297 = vmatmul.mubr.msk.f32.vlgmr.msra.gmra.mrb[32].mxu1 %vm89_vm0, %v2714_v53 }
0x144b   :  { %v3298_v55 = vpop.f32.mrb[32].mxu1 }
0x144c   :  { %v2804_v56 = vadd.f32 %v3298_v55, %v2939_v54  ;;  %v2798_v57 = vpop.f32.mrb[33].mxu1 }
0x144d   :  { %v2799_v58 = vadd.f32 %v2939_v54, %v2798_v57 }
0x144e   :  { %2809 = vmax.xlane.f32.xlu0 %v2804_v56 }
0x144f   :  { %2807 = vmax.xlane.f32.xlu1 %v2799_v58 }
0x14db   :  { %v2810_v59 = vpop.xlane.xlu0 %2809 }
0x14dc   :  { %v2812_v60 = vsub.f32 %v2804_v56, %v2810_v59  ;;  %v2808_v61 = vpop.xlane.xlu1 %2807 }
0x14dd   :  { %v2811_v62 = vsub.f32 %v2799_v58, %v2808_v61 }
0x14de   :  { %v2815_v19 = vmul.f32 1.442695, %v2812_v60 }
0x14df   :  { %v2813_v63 = vmul.f32 1.442695, %v2811_v62 }
0x14e0   :  { %3472 = vpow2.f32 %v2815_v19 }
0x14e1   :  { %3474 = vpow2.f32 %v2813_v63 }
0x14ea   :  { %v3473_v0 = vpop.eup %3472 }
0x14eb   :  { %v3475_v1 = vpop.eup %3474  ;;  %2819 = vadd.xlane.f32.xlu0 %v3473_v0 }
0x14ec   :  { %2817 = vadd.xlane.f32.xlu1 %v3475_v1 }
0x1578   :  { %v2820_v2 = vpop.xlane.xlu0 %2819 }
0x1579   :  { %3476 = vlog2.f32 %v2820_v2  ;;  %v2818_v3 = vpop.xlane.xlu1 %2817 }
0x157a   :  { %3478 = vlog2.f32 %v2818_v3 }
0x1583   :  { %v3477_v4 = vpop.eup %3476 }
0x1584   :  { %v3479_v5 = vpop.eup %3478  ;;  %v2824_v6 = vmul.f32 0.6931472, %v3477_v4 }
0x1585   :  { %v2822_v7 = vmul.f32 0.6931472, %v3479_v5 }
0x1586   :  { %v2826_v8 = vsub.f32 %v2812_v60, %v2824_v6 }
0x1587   :  { %v2825_v9 = vsub.f32 %v2811_v62, %v2822_v7 }
0x1588   :  { %2828 = vst [vmem:[%s4056_s20 + $0x8] sm:$0xff] %v2826_v8 }
0x1589   :  { %2827 = vst [vmem:[%s4056_s20] sm:$0xff] %v2825_v9 }

</bundles_post_ra>
